<compile_context>
chip_gen: v5e
topology: v5e:2x2
jax: 0.10.0
libtpu: 0.0.40
codegen_flags: <defaults>
</compile_context>

<pallas_src>
import functools

import jax
import jax.numpy as jnp
from jax.experimental import pallas as pl
from jax.experimental.pallas import tpu as pltpu


def _round_up(x, m):
    return ((x + m - 1) // m) * m


# -----------------------------------------------------------------------------
# pltpu.roll rotation-direction probe.
# The kernel needs shift(x, d)[t] == x[t - d]  (i.e. jnp.roll(x, +d, axis=0)).
# The sign convention of the TPU rotate primitive has not been stable across JAX
# versions, so probe it once with a tiny kernel and fall back to a guaranteed-
# correct concatenate-based shift if the probe is inconclusive or fails.
_ROLL_MODE = None


def _probe_roll_mode():
    global _ROLL_MODE
    if _ROLL_MODE is not None:
        return _ROLL_MODE
    try:
        def _k(x_ref, o_ref):
            o_ref[...] = pltpu.roll(x_ref[...], 1, 0)

        x = jnp.tile(jnp.arange(8, dtype=jnp.float32)[:, None], (1, 128))
        y = jax.device_get(
            pl.pallas_call(_k, out_shape=jax.ShapeDtypeStruct((8, 128), jnp.float32))(x))
        if y[0, 0] == 7.0 and y[1, 0] == 0.0:      # matches jnp.roll(x, +1, axis=0)
            _ROLL_MODE = "pos"
        elif y[0, 0] == 1.0 and y[1, 0] == 2.0:    # opposite rotation convention
            _ROLL_MODE = "neg"
        else:
            _ROLL_MODE = "concat"
    except Exception:
        _ROLL_MODE = "concat"
    return _ROLL_MODE


def _make_shift_rows(mode):
    """shift(x, d)[t] == x[t - d] (rows t < d hold junk that is never read as valid)."""
    def shift(x, d):
        n = x.shape[0]
        d = d % n
        if d == 0:
            return x
        if mode == "pos":
            return pltpu.roll(x, d, 0)
        if mode == "neg":
            return pltpu.roll(x, n - d, 0)
        # Fallback: unambiguous concat-based roll (still a single shift per layer).
        return jnp.concatenate([x[n - d:], x[:n - d]], axis=0)
    return shift


# -----------------------------------------------------------------------------
# Kernel: one batch element per grid step; activations are (T_pad, C_pad) with
# channels on the 128-lane axis.
def _wavenet_kernel(dilations, c_pad, shift_rows,
                    x_ref, gate_b_ref,
                    w_pre_ref, b_pre_ref,
                    wfg0_ref, wfg1_ref,
                    w11_ref, b11_ref,
                    w_p1_ref, b_p1_ref,
                    w_p2_ref, b_p2_ref,
                    out_ref):
    f32 = jnp.float32
    mdt = w_pre_ref.dtype                       # MXU operand dtype (bf16 or f32)

    def mm(a, w):                               # lane-dense MXU matmul, f32 accumulate
        return jnp.dot(a.astype(mdt), w, preferred_element_type=f32)

    # Part 1: pre-processing 1x1 conv.
    h = mm(x_ref[...], w_pre_ref[...]) + b_pre_ref[...]        # (T_pad, C_pad) f32
    h_pre = h

    # Part 2: gated dilated residual layers.  Row t of every buffer is original
    # input sample t; rows below the accumulated receptive field hold junk that
    # never contaminates a valid output row.
    for l, d in enumerate(dilations):
        h_old = shift_rows(h, d)                               # h_old[t] == h[t - d]
        # Fused f|g gate matmuls (one per tap); conv + global-conditioning biases
        # are pre-folded into gate_b (one broadcast add per layer).
        fg = mm(h_old, wfg0_ref[l]) + mm(h, wfg1_ref[l]) + gate_b_ref[l]
        z = jnp.tanh(fg[:, :c_pad]) * jax.nn.sigmoid(fg[:, c_pad:])
        # Residual: in original-time coordinates the skip lands on the same rows.
        h = h + mm(z, w11_ref[l]) + b11_ref[l]

    # Part 3: skip-sum via the telescoping identity
    #   h_final[t] - h_pre[t] == sum_l skip_l[t]   (== the reference's cropped skip sum)
    # then ReLU -> 1x1 -> ReLU -> 1x1.  No per-layer skip tensors are kept live.
    y = jnp.maximum(h - h_pre, 0.0)
    y = jnp.maximum(mm(y, w_p1_ref[...]) + b_p1_ref[...], 0.0)
    y = mm(y, w_p2_ref[...]) + b_p2_ref[...]
    out_ref[...] = y


# -----------------------------------------------------------------------------
# Wrapper: pads/fuses parameters, precomputes global-conditioning biases, sets up
# the batch grid, and crops/transposes back to the PyTorch (B, bins, T_out) layout.
def wavenet_forward(x_ncl, gc, params, dilations, *, matmul_dtype=jnp.bfloat16):
    f32 = jnp.float32
    B, bins, T = x_ncl.shape
    L = len(dilations)
    C = params["w_pre"].shape[0]
    R = sum(dilations)
    T_out = T - R
    CP = _round_up(C, 128)          # lane-dense residual channels
    BP = _round_up(bins, 128)       # lane-dense quantization bins
    TP = _round_up(T, 16)           # sublane-aligned time (16 also covers bf16 packing)

    def pad_to(a, axis, size):
        pad = [(0, 0)] * a.ndim
        pad[axis] = (0, size - a.shape[axis])
        return jnp.pad(a, pad)

    # Activations: NCL -> (B, T_pad, bins_pad), channels on lanes.
    x = pad_to(pad_to(jnp.transpose(x_ncl, (0, 2, 1)).astype(f32), 1, TP), 2, BP)
    x = x.astype(matmul_dtype)
    gc = gc.astype(f32)

    # Pre 1x1 conv: (C, bins) -> (bins_pad, C_pad) laid out [cin, cout].
    w_pre = pad_to(pad_to(params["w_pre"].astype(f32).T, 0, BP), 1, CP).astype(matmul_dtype)
    b_pre = pad_to(params["b_pre"].astype(f32)[None, :], 1, CP)

    # Fused gate convs: per tap k, concat f|g along cout -> (L, C_pad, 2*C_pad).
    def fused_tap(k):
        wf = pad_to(pad_to(jnp.transpose(params["wf"][..., k], (0, 2, 1)).astype(f32), 1, CP), 2, CP)
        wg = pad_to(pad_to(jnp.transpose(params["wg"][..., k], (0, 2, 1)).astype(f32), 1, CP), 2, CP)
        return jnp.concatenate([wf, wg], axis=2).astype(matmul_dtype)
    wfg0, wfg1 = fused_tap(0), fused_tap(1)

    # Global conditioning + all per-layer gate biases folded into one (L, B, 1, 2*C_pad).
    f_b = jnp.einsum("bi,lci->lbc", gc, params["wgcf"].astype(f32)) \
        + (params["bgcf"] + params["bf"]).astype(f32)[:, None, :]
    g_b = jnp.einsum("bi,lci->lbc", gc, params["wgcg"].astype(f32)) \
        + (params["bgcg"] + params["bg"]).astype(f32)[:, None, :]
    gate_b = jnp.concatenate([pad_to(f_b, 2, CP), pad_to(g_b, 2, CP)], axis=2)[:, :, None, :]

    # Residual 1x1 convs and post-processing convs.
    w11 = pad_to(pad_to(jnp.transpose(params["w11"], (0, 2, 1)).astype(f32), 1, CP), 2, CP)
    w11 = w11.astype(matmul_dtype)
    b11 = pad_to(params["b11"].astype(f32)[:, None, :], 2, CP)
    w_p1 = pad_to(pad_to(params["w_post1"].astype(f32).T, 0, CP), 1, CP).astype(matmul_dtype)
    b_p1 = pad_to(params["b_post1"].astype(f32)[None, :], 1, CP)
    w_p2 = pad_to(pad_to(params["w_post2"].astype(f32).T, 0, CP), 1, BP).astype(matmul_dtype)
    b_p2 = pad_to(params["b_post2"].astype(f32)[None, :], 1, BP)

    kernel = functools.partial(_wavenet_kernel, tuple(dilations), CP,
                               _make_shift_rows(_probe_roll_mode()))

    def _wspec(a):   # full-extent, batch-invariant blocks: weights stay VMEM-resident
        return pl.BlockSpec(tuple(a.shape), lambda b, _n=a.ndim: (0,) * _n)

    out_full = pl.pallas_call(
        kernel,
        out_shape=jax.ShapeDtypeStruct((B, TP, BP), f32),
        grid=(B,),
        in_specs=[
            pl.BlockSpec((None, TP, BP), lambda b: (b, 0, 0)),           # x
            pl.BlockSpec((L, None, 1, 2 * CP), lambda b: (0, b, 0, 0)),  # gate biases
            _wspec(w_pre), _wspec(b_pre),
            _wspec(wfg0), _wspec(wfg1),
            _wspec(w11), _wspec(b11),
            _wspec(w_p1), _wspec(b_p1),
            _wspec(w_p2), _wspec(b_p2),
        ],
        out_specs=pl.BlockSpec((None, TP, BP), lambda b: (b, 0, 0)),
        compiler_params=pltpu.CompilerParams(dimension_semantics=("parallel",)),
    )(x, gate_b, w_pre, b_pre, wfg0, wfg1, w11, b11, w_p1, b_p1, w_p2, b_p2)

    # Valid output rows are original times [R, T); crop and return NCL like PyTorch.
    return jnp.transpose(out_full[:, R:R + T_out, :bins], (0, 2, 1))


# ---------------- pure-JAX reference (mirrors the PyTorch module exactly) ------------
def wavenet_reference(x, gc, params, dilations):
    def conv1d(h, w, b, d=1):
        y = jax.lax.conv_general_dilated(
            h, w, window_strides=(1,), padding="VALID", rhs_dilation=(d,),
            dimension_numbers=("NCH", "OIH", "NCH"))
        return y + b[None, :, None]

    h = conv1d(x, params["w_pre"][:, :, None], params["b_pre"])
    skips = []
    for l, d in enumerate(dilations):
        f_x = conv1d(h, params["wf"][l], params["bf"][l], d)
        g_x = conv1d(h, params["wg"][l], params["bg"][l], d)
        f_gc = (gc @ params["wgcf"][l].T + params["bgcf"][l])[:, :, None]
        g_gc = (gc @ params["wgcg"][l].T + params["bgcg"][l])[:, :, None]
        f = jnp.tanh(f_x + f_gc)
        g = jax.nn.sigmoid(g_x + g_gc)
        z = f * g
        skip = conv1d(z, params["w11"][l][:, :, None], params["b11"][l])
        h = h[:, :, d:] + skip
        skips.append(skip)
    last = skips[-1].shape[2]
    y = sum(s[:, :, -last:] for s in skips)
    y = jnp.maximum(y, 0.0)
    y = conv1d(y, params["w_post1"][:, :, None], params["b_post1"])
    y = jnp.maximum(y, 0.0)
    y = conv1d(y, params["w_post2"][:, :, None], params["b_post2"])
    return y


if __name__ == "__main__":
    B, bins, C, T = 2, 8, 8, 16
    dilation_depth, blocks = 3, 1
    dilations = [2 ** i for i in range(dilation_depth)] * blocks   # [1, 2, 4]
    L = len(dilations)

    key = jax.random.PRNGKey(0)
    keys = jax.random.split(key, 18)

    def init(k, shape, scale=0.2):
        return (scale * jax.random.normal(k, shape)).astype(jnp.float32)

    params = {
        "w_pre":   init(keys[0],  (C, bins)),
        "b_pre":   init(keys[1],  (C,)),
        "wf":      init(keys[2],  (L, C, C, 2)),
        "bf":      init(keys[3],  (L, C)),
        "wg":      init(keys[4],  (L, C, C, 2)),
        "bg":      init(keys[5],  (L, C)),
        "wgcf":    init(keys[6],  (L, C, 10)),
        "bgcf":    init(keys[7],  (L, C)),
        "wgcg":    init(keys[8],  (L, C, 10)),
        "bgcg":    init(keys[9],  (L, C)),
        "w11":     init(keys[10], (L, C, C)),
        "b11":     init(keys[11], (L, C)),
        "w_post1": init(keys[12], (C, C)),
        "b_post1": init(keys[13], (C,)),
        "w_post2": init(keys[14], (bins, C)),
        "b_post2": init(keys[15], (bins,)),
    }

    x = jax.random.normal(keys[16], (B, bins, T), dtype=jnp.float32)
    gc = jax.random.normal(keys[17], (B, 10), dtype=jnp.float32)

    T_out = T - sum(dilations)
    ref = wavenet_reference(x, gc, params, dilations)

    # Exact-semantics check: f32 matmul path must match the reference tightly.
    out_f32 = jax.block_until_ready(
        wavenet_forward(x, gc, params, dilations, matmul_dtype=jnp.float32))
    assert out_f32.shape == (B, bins, T_out), out_f32.shape
    err_f32 = float(jnp.max(jnp.abs(out_f32 - ref)))
    assert jnp.allclose(out_f32, ref, atol=2e-4, rtol=2e-4), err_f32

    # Default fast path: bf16 MXU operands, f32 accumulation / gate math
    # (tolerance reflects bf16 operand quantization only).
    out = jax.block_until_ready(wavenet_forward(x, gc, params, dilations))
    assert out.shape == (B, bins, T_out), out.shape
    err_bf16 = float(jnp.max(jnp.abs(out - ref)))
    assert jnp.allclose(out, ref, atol=5e-2, rtol=5e-2), err_bf16

    print("KERNEL_OK")
</pallas_src>

<mosaic_0001>
module attributes {stable_mosaic.version = 11 : i64} {
  func.func @_k(%arg0: memref<8x128xf32, #tpu.memory_space<vmem>>, %arg1: memref<8x128xf32, #tpu.memory_space<vmem>>) attributes {dimension_semantics = [], scalar_prefetch = 0 : i64, scratch_operands = 0 : i64, tpu.core_type = #tpu.core_type<tc>} {
    %c0 = arith.constant 0 : index
    %c0_0 = arith.constant 0 : index
    %0 = vector.load %arg0[%c0, %c0_0] : memref<8x128xf32, #tpu.memory_space<vmem>>, vector<8x128xf32>
    %c1_i32 = arith.constant 1 : i32
    %1 = tpu.dynamic_rotate %0 by %c1_i32 dim 0 : vector<8x128xf32>, i32 -> vector<8x128xf32>
    %c0_1 = arith.constant 0 : index
    %c0_2 = arith.constant 0 : index
    %2 = vector.load %arg1[%c0_1, %c0_2] : memref<8x128xf32, #tpu.memory_space<vmem>>, vector<8x128xf32>
    tpu.vector_store %arg1[%c0_1, %c0_2], %1 {strides = array<i32>} : memref<8x128xf32, #tpu.memory_space<vmem>>, vector<8x128xf32>,
    return
  }
}

module attributes {stable_mosaic.version = 11 : i64} {
  func.func @_wavenet_kernel(%arg0: i32, %arg1: memref<1x16x128xf32, #tpu.memory_space<vmem>>, %arg2: memref<3x1x1x256xf32, #tpu.memory_space<vmem>>, %arg3: memref<128x128xf32, #tpu.memory_space<vmem>>, %arg4: memref<1x128xf32, #tpu.memory_space<vmem>>, %arg5: memref<3x128x256xf32, #tpu.memory_space<vmem>>, %arg6: memref<3x128x256xf32, #tpu.memory_space<vmem>>, %arg7: memref<3x128x128xf32, #tpu.memory_space<vmem>>, %arg8: memref<3x1x128xf32, #tpu.memory_space<vmem>>, %arg9: memref<128x128xf32, #tpu.memory_space<vmem>>, %arg10: memref<1x128xf32, #tpu.memory_space<vmem>>, %arg11: memref<128x128xf32, #tpu.memory_space<vmem>>, %arg12: memref<1x128xf32, #tpu.memory_space<vmem>>, %arg13: memref<1x16x128xf32, #tpu.memory_space<vmem>>) attributes {dimension_semantics = [#tpu.dimension_semantics<parallel>], iteration_bounds = array<i64: 2>, scalar_prefetch = 0 : i64, scratch_operands = 0 : i64, tpu.core_type = #tpu.core_type<tc>, window_params = [{transform_indices = @transform_0, window_bounds = array<i64: 1, 16, 128>}, {transform_indices = @transform_1, window_bounds = array<i64: 3, 1, 1, 256>}, {pipeline_mode = #tpu.pipeline_mode<synchronous>, transform_indices = @transform_2, window_bounds = array<i64: 128, 128>}, {pipeline_mode = #tpu.pipeline_mode<synchronous>, transform_indices = @transform_3, window_bounds = array<i64: 1, 128>}, {pipeline_mode = #tpu.pipeline_mode<synchronous>, transform_indices = @transform_4, window_bounds = array<i64: 3, 128, 256>}, {pipeline_mode = #tpu.pipeline_mode<synchronous>, transform_indices = @transform_5, window_bounds = array<i64: 3, 128, 256>}, {pipeline_mode = #tpu.pipeline_mode<synchronous>, transform_indices = @transform_6, window_bounds = array<i64: 3, 128, 128>}, {pipeline_mode = #tpu.pipeline_mode<synchronous>, transform_indices = @transform_7, window_bounds = array<i64: 3, 1, 128>}, {pipeline_mode = #tpu.pipeline_mode<synchronous>, transform_indices = @transform_8, window_bounds = array<i64: 128, 128>}, {pipeline_mode = #tpu.pipeline_mode<synchronous>, transform_indices = @transform_9, window_bounds = array<i64: 1, 128>}, {pipeline_mode = #tpu.pipeline_mode<synchronous>, transform_indices = @transform_10, window_bounds = array<i64: 128, 128>}, {pipeline_mode = #tpu.pipeline_mode<synchronous>, transform_indices = @transform_11, window_bounds = array<i64: 1, 128>}, {transform_indices = @transform_12, window_bounds = array<i64: 1, 16, 128>}]} {
    %c0 = arith.constant 0 : index
    %c0_0 = arith.constant 0 : index
    %c0_1 = arith.constant 0 : index
    %0 = vector.load %arg1[%c0, %c0_0, %c0_1] : memref<1x16x128xf32, #tpu.memory_space<vmem>>, vector<1x16x128xf32>
    %1 = vector.shape_cast %0 : vector<1x16x128xf32> to vector<16x128xf32>
    %c0_2 = arith.constant 0 : index
    %c0_3 = arith.constant 0 : index
    %2 = vector.load %arg3[%c0_2, %c0_3] : memref<128x128xf32, #tpu.memory_space<vmem>>, vector<128x128xf32>
    %cst = arith.constant dense<0.000000e+00> : vector<16x128xf32>
    %3 = tpu.matmul %1, %2, %cst {dimension_numbers = #tpu.dot_dimension_numbers<[1], [0], [0], [1], [0, 0, 1, 1], [], []>} : vector<16x128xf32>, vector<128x128xf32>, vector<16x128xf32> -> vector<16x128xf32>
    %c0_4 = arith.constant 0 : index
    %c0_5 = arith.constant 0 : index
    %4 = vector.load %arg4[%c0_4, %c0_5] : memref<1x128xf32, #tpu.memory_space<vmem>>, vector<1x128xf32>
    %5 = vector.broadcast %4 : vector<1x128xf32> to vector<16x128xf32>
    %6 = arith.addf %3, %5 : vector<16x128xf32>
    %7 = vector.extract_strided_slice %6 {offsets = [15, 0], sizes = [1, 128], strides = [1, 1]} : vector<16x128xf32> to vector<1x128xf32>
    %8 = vector.extract_strided_slice %6 {offsets = [0, 0], sizes = [15, 128], strides = [1, 1]} : vector<16x128xf32> to vector<15x128xf32>
    %9 = tpu.concatenate %7, %8 in 0 : vector<1x128xf32>, vector<15x128xf32> -> vector<16x128xf32>
    %c0_6 = arith.constant 0 : index
    %c0_7 = arith.constant 0 : index
    %c0_8 = arith.constant 0 : index
    %10 = vector.load %arg5[%c0_6, %c0_7, %c0_8] : memref<3x128x256xf32, #tpu.memory_space<vmem>>, vector<1x128x256xf32>
    %11 = vector.shape_cast %10 : vector<1x128x256xf32> to vector<128x256xf32>
    %cst_9 = arith.constant dense<0.000000e+00> : vector<16x256xf32>
    %12 = tpu.matmul %9, %11, %cst_9 {dimension_numbers = #tpu.dot_dimension_numbers<[1], [0], [0], [1], [0, 0, 1, 1], [], []>} : vector<16x128xf32>, vector<128x256xf32>, vector<16x256xf32> -> vector<16x256xf32>
    %c0_10 = arith.constant 0 : index
    %c0_11 = arith.constant 0 : index
    %c0_12 = arith.constant 0 : index
    %13 = vector.load %arg6[%c0_10, %c0_11, %c0_12] : memref<3x128x256xf32, #tpu.memory_space<vmem>>, vector<1x128x256xf32>
    %14 = vector.shape_cast %13 : vector<1x128x256xf32> to vector<128x256xf32>
    %cst_13 = arith.constant dense<0.000000e+00> : vector<16x256xf32>
    %15 = tpu.matmul %6, %14, %cst_13 {dimension_numbers = #tpu.dot_dimension_numbers<[1], [0], [0], [1], [0, 0, 1, 1], [], []>} : vector<16x128xf32>, vector<128x256xf32>, vector<16x256xf32> -> vector<16x256xf32>
    %16 = arith.addf %12, %15 : vector<16x256xf32>
    %c0_14 = arith.constant 0 : index
    %c0_15 = arith.constant 0 : index
    %c0_16 = arith.constant 0 : index
    %c0_17 = arith.constant 0 : index
    %17 = vector.load %arg2[%c0_14, %c0_15, %c0_16, %c0_17] : memref<3x1x1x256xf32, #tpu.memory_space<vmem>>, vector<1x1x1x256xf32>
    %18 = vector.shape_cast %17 : vector<1x1x1x256xf32> to vector<1x256xf32>
    %19 = vector.broadcast %18 : vector<1x256xf32> to vector<16x256xf32>
    %20 = arith.addf %16, %19 : vector<16x256xf32>
    %21 = vector.extract_strided_slice %20 {offsets = [0, 0], sizes = [16, 128], strides = [1, 1]} : vector<16x256xf32> to vector<16x128xf32>
    %22 = math.tanh %21 : vector<16x128xf32>
    %23 = vector.extract_strided_slice %20 {offsets = [0, 128], sizes = [16, 128], strides = [1, 1]} : vector<16x256xf32> to vector<16x128xf32>
    %24 = arith.negf %23 : vector<16x128xf32>
    %25 = math.exp %24 : vector<16x128xf32>
    %cst_18 = arith.constant 1.000000e+00 : f32
    %26 = vector.broadcast %cst_18 : f32 to vector<16x128xf32>
    %27 = arith.addf %26, %25 : vector<16x128xf32>
    %28 = arith.divf %26, %27 : vector<16x128xf32>
    %29 = arith.mulf %22, %28 : vector<16x128xf32>
    %c0_19 = arith.constant 0 : index
    %c0_20 = arith.constant 0 : index
    %c0_21 = arith.constant 0 : index
    %30 = vector.load %arg7[%c0_19, %c0_20, %c0_21] : memref<3x128x128xf32, #tpu.memory_space<vmem>>, vector<1x128x128xf32>
    %31 = vector.shape_cast %30 : vector<1x128x128xf32> to vector<128x128xf32>
    %cst_22 = arith.constant dense<0.000000e+00> : vector<16x128xf32>
    %32 = tpu.matmul %29, %31, %cst_22 {dimension_numbers = #tpu.dot_dimension_numbers<[1], [0], [0], [1], [0, 0, 1, 1], [], []>} : vector<16x128xf32>, vector<128x128xf32>, vector<16x128xf32> -> vector<16x128xf32>
    %33 = arith.addf %6, %32 : vector<16x128xf32>
    %c0_23 = arith.constant 0 : index
    %c0_24 = arith.constant 0 : index
    %c0_25 = arith.constant 0 : index
    %34 = vector.load %arg8[%c0_23, %c0_24, %c0_25] : memref<3x1x128xf32, #tpu.memory_space<vmem>>, vector<1x1x128xf32>
    %35 = vector.shape_cast %34 : vector<1x1x128xf32> to vector<1x128xf32>
    %36 = vector.broadcast %35 : vector<1x128xf32> to vector<16x128xf32>
    %37 = arith.addf %33, %36 : vector<16x128xf32>
    %38 = vector.extract_strided_slice %37 {offsets = [14, 0], sizes = [2, 128], strides = [1, 1]} : vector<16x128xf32> to vector<2x128xf32>
    %39 = vector.extract_strided_slice %37 {offsets = [0, 0], sizes = [14, 128], strides = [1, 1]} : vector<16x128xf32> to vector<14x128xf32>
    %40 = tpu.concatenate %38, %39 in 0 : vector<2x128xf32>, vector<14x128xf32> -> vector<16x128xf32>
    %c1 = arith.constant 1 : index
    %c0_26 = arith.constant 0 : index
    %c0_27 = arith.constant 0 : index
    %41 = vector.load %arg5[%c1, %c0_26, %c0_27] : memref<3x128x256xf32, #tpu.memory_space<vmem>>, vector<1x128x256xf32>
    %42 = vector.shape_cast %41 : vector<1x128x256xf32> to vector<128x256xf32>
    %cst_28 = arith.constant dense<0.000000e+00> : vector<16x256xf32>
    %43 = tpu.matmul %40, %42, %cst_28 {dimension_numbers = #tpu.dot_dimension_numbers<[1], [0], [0], [1], [0, 0, 1, 1], [], []>} : vector<16x128xf32>, vector<128x256xf32>, vector<16x256xf32> -> vector<16x256xf32>
    %c1_29 = arith.constant 1 : index
    %c0_30 = arith.constant 0 : index
    %c0_31 = arith.constant 0 : index
    %44 = vector.load %arg6[%c1_29, %c0_30, %c0_31] : memref<3x128x256xf32, #tpu.memory_space<vmem>>, vector<1x128x256xf32>
    %45 = vector.shape_cast %44 : vector<1x128x256xf32> to vector<128x256xf32>
    %cst_32 = arith.constant dense<0.000000e+00> : vector<16x256xf32>
    %46 = tpu.matmul %37, %45, %cst_32 {dimension_numbers = #tpu.dot_dimension_numbers<[1], [0], [0], [1], [0, 0, 1, 1], [], []>} : vector<16x128xf32>, vector<128x256xf32>, vector<16x256xf32> -> vector<16x256xf32>
    %47 = arith.addf %43, %46 : vector<16x256xf32>
    %c1_33 = arith.constant 1 : index
    %c0_34 = arith.constant 0 : index
    %c0_35 = arith.constant 0 : index
    %c0_36 = arith.constant 0 : index
    %48 = vector.load %arg2[%c1_33, %c0_34, %c0_35, %c0_36] : memref<3x1x1x256xf32, #tpu.memory_space<vmem>>, vector<1x1x1x256xf32>
    %49 = vector.shape_cast %48 : vector<1x1x1x256xf32> to vector<1x256xf32>
    %50 = vector.broadcast %49 : vector<1x256xf32> to vector<16x256xf32>
    %51 = arith.addf %47, %50 : vector<16x256xf32>
    %52 = vector.extract_strided_slice %51 {offsets = [0, 0], sizes = [16, 128], strides = [1, 1]} : vector<16x256xf32> to vector<16x128xf32>
    %53 = math.tanh %52 : vector<16x128xf32>
    %54 = vector.extract_strided_slice %51 {offsets = [0, 128], sizes = [16, 128], strides = [1, 1]} : vector<16x256xf32> to vector<16x128xf32>
    %55 = arith.negf %54 : vector<16x128xf32>
    %56 = math.exp %55 : vector<16x128xf32>
    %cst_37 = arith.constant 1.000000e+00 : f32
    %57 = vector.broadcast %cst_37 : f32 to vector<16x128xf32>
    %58 = arith.addf %57, %56 : vector<16x128xf32>
    %59 = arith.divf %57, %58 : vector<16x128xf32>
    %60 = arith.mulf %53, %59 : vector<16x128xf32>
    %c1_38 = arith.constant 1 : index
    %c0_39 = arith.constant 0 : index
    %c0_40 = arith.constant 0 : index
    %61 = vector.load %arg7[%c1_38, %c0_39, %c0_40] : memref<3x128x128xf32, #tpu.memory_space<vmem>>, vector<1x128x128xf32>
    %62 = vector.shape_cast %61 : vector<1x128x128xf32> to vector<128x128xf32>
    %cst_41 = arith.constant dense<0.000000e+00> : vector<16x128xf32>
    %63 = tpu.matmul %60, %62, %cst_41 {dimension_numbers = #tpu.dot_dimension_numbers<[1], [0], [0], [1], [0, 0, 1, 1], [], []>} : vector<16x128xf32>, vector<128x128xf32>, vector<16x128xf32> -> vector<16x128xf32>
    %64 = arith.addf %37, %63 : vector<16x128xf32>
    %c1_42 = arith.constant 1 : index
    %c0_43 = arith.constant 0 : index
    %c0_44 = arith.constant 0 : index
    %65 = vector.load %arg8[%c1_42, %c0_43, %c0_44] : memref<3x1x128xf32, #tpu.memory_space<vmem>>, vector<1x1x128xf32>
    %66 = vector.shape_cast %65 : vector<1x1x128xf32> to vector<1x128xf32>
    %67 = vector.broadcast %66 : vector<1x128xf32> to vector<16x128xf32>
    %68 = arith.addf %64, %67 : vector<16x128xf32>
    %69 = vector.extract_strided_slice %68 {offsets = [12, 0], sizes = [4, 128], strides = [1, 1]} : vector<16x128xf32> to vector<4x128xf32>
    %70 = vector.extract_strided_slice %68 {offsets = [0, 0], sizes = [12, 128], strides = [1, 1]} : vector<16x128xf32> to vector<12x128xf32>
    %71 = tpu.concatenate %69, %70 in 0 : vector<4x128xf32>, vector<12x128xf32> -> vector<16x128xf32>
    %c2 = arith.constant 2 : index
    %c0_45 = arith.constant 0 : index
    %c0_46 = arith.constant 0 : index
    %72 = vector.load %arg5[%c2, %c0_45, %c0_46] : memref<3x128x256xf32, #tpu.memory_space<vmem>>, vector<1x128x256xf32>
    %73 = vector.shape_cast %72 : vector<1x128x256xf32> to vector<128x256xf32>
    %cst_47 = arith.constant dense<0.000000e+00> : vector<16x256xf32>
    %74 = tpu.matmul %71, %73, %cst_47 {dimension_numbers = #tpu.dot_dimension_numbers<[1], [0], [0], [1], [0, 0, 1, 1], [], []>} : vector<16x128xf32>, vector<128x256xf32>, vector<16x256xf32> -> vector<16x256xf32>
    %c2_48 = arith.constant 2 : index
    %c0_49 = arith.constant 0 : index
    %c0_50 = arith.constant 0 : index
    %75 = vector.load %arg6[%c2_48, %c0_49, %c0_50] : memref<3x128x256xf32, #tpu.memory_space<vmem>>, vector<1x128x256xf32>
    %76 = vector.shape_cast %75 : vector<1x128x256xf32> to vector<128x256xf32>
    %cst_51 = arith.constant dense<0.000000e+00> : vector<16x256xf32>
    %77 = tpu.matmul %68, %76, %cst_51 {dimension_numbers = #tpu.dot_dimension_numbers<[1], [0], [0], [1], [0, 0, 1, 1], [], []>} : vector<16x128xf32>, vector<128x256xf32>, vector<16x256xf32> -> vector<16x256xf32>
    %78 = arith.addf %74, %77 : vector<16x256xf32>
    %c2_52 = arith.constant 2 : index
    %c0_53 = arith.constant 0 : index
    %c0_54 = arith.constant 0 : index
    %c0_55 = arith.constant 0 : index
    %79 = vector.load %arg2[%c2_52, %c0_53, %c0_54, %c0_55] : memref<3x1x1x256xf32, #tpu.memory_space<vmem>>, vector<1x1x1x256xf32>
    %80 = vector.shape_cast %79 : vector<1x1x1x256xf32> to vector<1x256xf32>
    %81 = vector.broadcast %80 : vector<1x256xf32> to vector<16x256xf32>
    %82 = arith.addf %78, %81 : vector<16x256xf32>
    %83 = vector.extract_strided_slice %82 {offsets = [0, 0], sizes = [16, 128], strides = [1, 1]} : vector<16x256xf32> to vector<16x128xf32>
    %84 = math.tanh %83 : vector<16x128xf32>
    %85 = vector.extract_strided_slice %82 {offsets = [0, 128], sizes = [16, 128], strides = [1, 1]} : vector<16x256xf32> to vector<16x128xf32>
    %86 = arith.negf %85 : vector<16x128xf32>
    %87 = math.exp %86 : vector<16x128xf32>
    %cst_56 = arith.constant 1.000000e+00 : f32
    %88 = vector.broadcast %cst_56 : f32 to vector<16x128xf32>
    %89 = arith.addf %88, %87 : vector<16x128xf32>
    %90 = arith.divf %88, %89 : vector<16x128xf32>
    %91 = arith.mulf %84, %90 : vector<16x128xf32>
    %c2_57 = arith.constant 2 : index
    %c0_58 = arith.constant 0 : index
    %c0_59 = arith.constant 0 : index
    %92 = vector.load %arg7[%c2_57, %c0_58, %c0_59] : memref<3x128x128xf32, #tpu.memory_space<vmem>>, vector<1x128x128xf32>
    %93 = vector.shape_cast %92 : vector<1x128x128xf32> to vector<128x128xf32>
    %cst_60 = arith.constant dense<0.000000e+00> : vector<16x128xf32>
    %94 = tpu.matmul %91, %93, %cst_60 {dimension_numbers = #tpu.dot_dimension_numbers<[1], [0], [0], [1], [0, 0, 1, 1], [], []>} : vector<16x128xf32>, vector<128x128xf32>, vector<16x128xf32> -> vector<16x128xf32>
    %95 = arith.addf %68, %94 : vector<16x128xf32>
    %c2_61 = arith.constant 2 : index
    %c0_62 = arith.constant 0 : index
    %c0_63 = arith.constant 0 : index
    %96 = vector.load %arg8[%c2_61, %c0_62, %c0_63] : memref<3x1x128xf32, #tpu.memory_space<vmem>>, vector<1x1x128xf32>
    %97 = vector.shape_cast %96 : vector<1x1x128xf32> to vector<1x128xf32>
    %98 = vector.broadcast %97 : vector<1x128xf32> to vector<16x128xf32>
    %99 = arith.addf %95, %98 : vector<16x128xf32>
    %100 = arith.subf %99, %6 : vector<16x128xf32>
    %cst_64 = arith.constant 0.000000e+00 : f32
    %101 = vector.broadcast %cst_64 : f32 to vector<16x128xf32>
    %102 = arith.maximumf %100, %101 : vector<16x128xf32>
    %c0_65 = arith.constant 0 : index
    %c0_66 = arith.constant 0 : index
    %103 = vector.load %arg9[%c0_65, %c0_66] : memref<128x128xf32, #tpu.memory_space<vmem>>, vector<128x128xf32>
    %cst_67 = arith.constant dense<0.000000e+00> : vector<16x128xf32>
    %104 = tpu.matmul %102, %103, %cst_67 {dimension_numbers = #tpu.dot_dimension_numbers<[1], [0], [0], [1], [0, 0, 1, 1], [], []>} : vector<16x128xf32>, vector<128x128xf32>, vector<16x128xf32> -> vector<16x128xf32>
    %c0_68 = arith.constant 0 : index
    %c0_69 = arith.constant 0 : index
    %105 = vector.load %arg10[%c0_68, %c0_69] : memref<1x128xf32, #tpu.memory_space<vmem>>, vector<1x128xf32>
    %106 = vector.broadcast %105 : vector<1x128xf32> to vector<16x128xf32>
    %107 = arith.addf %104, %106 : vector<16x128xf32>
    %cst_70 = arith.constant 0.000000e+00 : f32
    %108 = vector.broadcast %cst_70 : f32 to vector<16x128xf32>
    %109 = arith.maximumf %107, %108 : vector<16x128xf32>
    %c0_71 = arith.constant 0 : index
    %c0_72 = arith.constant 0 : index
    %110 = vector.load %arg11[%c0_71, %c0_72] : memref<128x128xf32, #tpu.memory_space<vmem>>, vector<128x128xf32>
    %cst_73 = arith.constant dense<0.000000e+00> : vector<16x128xf32>
    %111 = tpu.matmul %109, %110, %cst_73 {dimension_numbers = #tpu.dot_dimension_numbers<[1], [0], [0], [1], [0, 0, 1, 1], [], []>} : vector<16x128xf32>, vector<128x128xf32>, vector<16x128xf32> -> vector<16x128xf32>
    %c0_74 = arith.constant 0 : index
    %c0_75 = arith.constant 0 : index
    %112 = vector.load %arg12[%c0_74, %c0_75] : memref<1x128xf32, #tpu.memory_space<vmem>>, vector<1x128xf32>
    %113 = vector.broadcast %112 : vector<1x128xf32> to vector<16x128xf32>
    %114 = arith.addf %111, %113 : vector<16x128xf32>
    %c0_76 = arith.constant 0 : index
    %c0_77 = arith.constant 0 : index
    %c0_78 = arith.constant 0 : index
    %115 = vector.load %arg13[%c0_76, %c0_77, %c0_78] : memref<1x16x128xf32, #tpu.memory_space<vmem>>, vector<1x16x128xf32>
    %116 = vector.shape_cast %115 : vector<1x16x128xf32> to vector<16x128xf32>
    %117 = vector.shape_cast %114 : vector<16x128xf32> to vector<1x16x128xf32>
    tpu.vector_store %arg13[%c0_76, %c0_77, %c0_78], %117 {strides = array<i32>} : memref<1x16x128xf32, #tpu.memory_space<vmem>>, vector<1x16x128xf32>,
    return
  }
  func.func @transform_0(%arg0: i32) -> (i32, i32, i32) {
    %c0_i32 = arith.constant 0 : i32
    %c0_i32_0 = arith.constant 0 : i32
    %c0_i32_1 = arith.constant 0 : i32
    return %arg0, %c0_i32, %c0_i32_0 : i32, i32, i32
  }
  func.func @transform_1(%arg0: i32) -> (i32, i32, i32, i32) {
    %c0_i32 = arith.constant 0 : i32
    %c0_i32_0 = arith.constant 0 : i32
    %c0_i32_1 = arith.constant 0 : i32
    %c0_i32_2 = arith.constant 0 : i32
    return %c0_i32, %arg0, %c0_i32_0, %c0_i32_1 : i32, i32, i32, i32
  }
  func.func @transform_2(%arg0: i32) -> (i32, i32) {
    %c0_i32 = arith.constant 0 : i32
    %c0_i32_0 = arith.constant 0 : i32
    %c0_i32_1 = arith.constant 0 : i32
    return %c0_i32, %c0_i32_0 : i32, i32
  }
  func.func @transform_3(%arg0: i32) -> (i32, i32) {
    %c0_i32 = arith.constant 0 : i32
    %c0_i32_0 = arith.constant 0 : i32
    %c0_i32_1 = arith.constant 0 : i32
    return %c0_i32, %c0_i32_0 : i32, i32
  }
  func.func @transform_4(%arg0: i32) -> (i32, i32, i32) {
    %c0_i32 = arith.constant 0 : i32
    %c0_i32_0 = arith.constant 0 : i32
    %c0_i32_1 = arith.constant 0 : i32
    %c0_i32_2 = arith.constant 0 : i32
    return %c0_i32, %c0_i32_0, %c0_i32_1 : i32, i32, i32
  }
  func.func @transform_5(%arg0: i32) -> (i32, i32, i32) {
    %c0_i32 = arith.constant 0 : i32
    %c0_i32_0 = arith.constant 0 : i32
    %c0_i32_1 = arith.constant 0 : i32
    %c0_i32_2 = arith.constant 0 : i32
    return %c0_i32, %c0_i32_0, %c0_i32_1 : i32, i32, i32
  }
  func.func @transform_6(%arg0: i32) -> (i32, i32, i32) {
    %c0_i32 = arith.constant 0 : i32
    %c0_i32_0 = arith.constant 0 : i32
    %c0_i32_1 = arith.constant 0 : i32
    %c0_i32_2 = arith.constant 0 : i32
    return %c0_i32, %c0_i32_0, %c0_i32_1 : i32, i32, i32
  }
  func.func @transform_7(%arg0: i32) -> (i32, i32, i32) {
    %c0_i32 = arith.constant 0 : i32
    %c0_i32_0 = arith.constant 0 : i32
    %c0_i32_1 = arith.constant 0 : i32
    %c0_i32_2 = arith.constant 0 : i32
    return %c0_i32, %c0_i32_0, %c0_i32_1 : i32, i32, i32
  }
  func.func @transform_8(%arg0: i32) -> (i32, i32) {
    %c0_i32 = arith.constant 0 : i32
    %c0_i32_0 = arith.constant 0 : i32
    %c0_i32_1 = arith.constant 0 : i32
    return %c0_i32, %c0_i32_0 : i32, i32
  }
  func.func @transform_9(%arg0: i32) -> (i32, i32) {
    %c0_i32 = arith.constant 0 : i32
    %c0_i32_0 = arith.constant 0 : i32
    %c0_i32_1 = arith.constant 0 : i32
    return %c0_i32, %c0_i32_0 : i32, i32
  }
  func.func @transform_10(%arg0: i32) -> (i32, i32) {
    %c0_i32 = arith.constant 0 : i32
    %c0_i32_0 = arith.constant 0 : i32
    %c0_i32_1 = arith.constant 0 : i32
    return %c0_i32, %c0_i32_0 : i32, i32
  }
  func.func @transform_11(%arg0: i32) -> (i32, i32) {
    %c0_i32 = arith.constant 0 : i32
    %c0_i32_0 = arith.constant 0 : i32
    %c0_i32_1 = arith.constant 0 : i32
    return %c0_i32, %c0_i32_0 : i32, i32
  }
  func.func @transform_12(%arg0: i32) -> (i32, i32, i32) {
    %c0_i32 = arith.constant 0 : i32
    %c0_i32_0 = arith.constant 0 : i32
    %c0_i32_1 = arith.constant 0 : i32
    return %arg0, %c0_i32, %c0_i32_0 : i32, i32, i32
  }
}

</mosaic_0001>

<bundles_post_ra>
// kernel: tpu_custom_call.1
= control target key start
LH: loop header
LB: loop body
LE: loop exit
PB: predicated region body
PF: predicated region fallthrough
CT: control target
= control target key end

     0   :  { %6 = vsyncpa [#allocation3], 0  ;;  %s115_s0 = inlined_call_operand.hbm [shape: f32[8,128], index: 0, kind: input, shape index: {}]   ;;  %s116_s1 = inlined_call_operand.hbm [shape: f32[8,128], index: 1, kind: output, shape index: {}]  }
   0x1   :  { %7 = vsyncpa [#allocation4], 0  ;;  %s13_s8 = sshll.u32 %s115_s0, 4  ;;  %s97_s9 = smov [#allocation2]   ;;  %s14_s8 = int_to_ptr.hbm [resolvable:$true] %s13_s8 }
   0x2   :  { %s15_s10 = sshll.u32 %s97_s9, 4  ;;  %s16_s10 = int_to_ptr.vmem [resolvable:$true] %s15_s10 }
   0x3   :  { %18 = dma.hbm_to_vmem [thread:$0]  %s14_s8, 128, %s16_s10, [#allocation3]  }
   0x4   :  { %93 = dma.done.wait [#allocation3], 128  }
   0x5   :  { %94 = vsyncadd [#allocation3], 4294967168  ;;  %s98_s11 = smov [#allocation5]   ;;  %s33_s15 = sshll.u32 %s116_s1, 4  ;;  %v23_v0 = vld [vmem:[#allocation2] sm:$0xff]  ;;  %s34_s15 = int_to_ptr.hbm [resolvable:$true] %s33_s15 }
   0x6   :  { %s31_s12 = sshll.u32 %s98_s11, 4  ;;  %v24_v1 = vrot.slane %v23_v0, 7  ;;  %s32_s12 = int_to_ptr.vmem [resolvable:$true] %s31_s12 }
   0x8   :  { %25 = vst [vmem:[#allocation5] sm:$0xff] %v24_v1 }
   0x9   :  { %36 = dma.vmem_to_hbm [thread:$0]  %s32_s12, 128, %s34_s15, [#allocation4]  }
   0xa   :  { %95 = dma.done.wait [#allocation4], 128  }
   0xb   :  { %96 = vsyncadd [#allocation4], 4294967168 }
   0xc   :  { %41 = vsyncpa [#allocation3], 1 }
   0xd   :  { %42 = vsyncpa [#allocation4], 1 }

// kernel: tpu_custom_call.1
= control target key start
LH: loop header
LB: loop body
LE: loop exit
PB: predicated region body
PF: predicated region fallthrough
CT: control target
= control target key end

     0   :  { %s2696_s0 = inlined_call_operand.hbm [shape: f32[2,16,128], index: 0, kind: input, shape index: {}]   ;;  %s2697_s1 = inlined_call_operand.hbm [shape: f32[3,2,1,256], index: 1, kind: input, shape index: {}]   ;;  %s2698_s2 = inlined_call_operand.hbm [shape: f32[128,128], index: 2, kind: input, shape index: {}]   ;;  %s2699_s3 = inlined_call_operand.vmem [shape: f32[1,128], index: 3, kind: input, shape index: {}]   ;;  %s2700_s4 = inlined_call_operand.hbm [shape: f32[3,128,256], index: 4, kind: input, shape index: {}]   ;;  %s2701_s5 = inlined_call_operand.hbm [shape: f32[3,128,256], index: 5, kind: input, shape index: {}]   ;;  %s2702_s6 = inlined_call_operand.hbm [shape: f32[3,128,128], index: 6, kind: input, shape index: {}]   ;;  %s2703_s7 = inlined_call_operand.vmem [shape: f32[3,1,128], index: 7, kind: input, shape index: {}]   ;;  %s2704_s8 = inlined_call_operand.hbm [shape: f32[128,128], index: 8, kind: input, shape index: {}]   ;;  %s2705_s9 = inlined_call_operand.vmem [shape: f32[1,128], index: 9, kind: input, shape index: {}]   ;;  %s2706_s10 = inlined_call_operand.hbm [shape: f32[128,128], index: 10, kind: input, shape index: {}]   ;;  %s2707_s11 = inlined_call_operand.vmem [shape: f32[1,128], index: 11, kind: input, shape index: {}]   ;;  %s2708_s12 = inlined_call_operand.hbm [shape: f32[2,16,128], index: 12, kind: output, shape index: {}]  }
   0x1   :  { %2713 = sst [smem:[#allocation26_spill]] %s2698_s2 }
   0x2   :  { %2714 = sst [smem:[#allocation27_spill]] %s2700_s4 }
   0x3   :  { %2715 = sst [smem:[#allocation28_spill]] %s2701_s5 }
   0x4   :  { %2716 = sst [smem:[#allocation29_spill]] %s2702_s6 }
   0x5   :  { %2717 = sst [smem:[#allocation30_spill]] %s2704_s8 }
   0x6   :  { %2718 = sst [smem:[#allocation31_spill]] %s2705_s9 }
   0x7   :  { %2719 = sst [smem:[#allocation32_spill]] %s2706_s10 }
   0x8   :  { %2720 = sst [smem:[#allocation33_spill]] %s2707_s11 }
   0x9   :  { %2721 = sst [smem:[#allocation34_spill]] %s2708_s12 }
   0xa   :  { %17 = vsyncpa [#allocation3], 0 }
   0xb   :  { %19 = vsyncpa [#allocation3 + $0x1], 0 }
   0xc   :  { %20 = vsyncpa [#allocation6], 0 }
   0xd   :  { %22 = vsyncpa [#allocation6 + $0x1], 0 }
   0xe   :  { %23 = vsyncpa [#allocation9], 0 }
   0xf   :  { %24 = vsyncpa [#allocation12], 0 }
  0x10   :  { %25 = vsyncpa [#allocation15], 0 }
  0x11   :  { %26 = vsyncpa [#allocation4], 0 }
  0x12   :  { %28 = vsyncpa [#allocation4 + $0x1], 0  ;;  %s2331_s21 = smov 0   ;;  %s2333_s22 = smov 0  }
  0x13   :  { %s2335_s23 = smov 0   ;;  %s2337_s24 = smov 0  }
  0x14 LB: > { %2722 = sst [smem:[#allocation24_spill]] %s2245_s23  ;;  %s2355_s28 = sadd.s32 4294967295, %s2249_s24   ;;  %s2249_s24 = sphi %s2337_s24, %s2747_s24   ;;  %s2245_s23 = sphi %s2335_s23, %s2744_s23   ;;  %s2241_s22 = sphi %s2333_s22, %s2746_s22   ;;  %s2237_s21 = sphi %s2331_s21, %s2745_s21  }
  0x15   : > { %s2723_s2 = sld [smem:[#allocation26_spill]]  ;;  %p1688_p0 = scmp.ge.s32.totalorder %s2249_s24, 1 }
  0x16   : > { %p55_p1 = scmp.eq.s32.totalorder %s2355_s28, 0  ;;  %p327_p2 = scmp.lt.s32.totalorder %s2249_s24, 3 }
  0x17   : > { %s2251_s30 = smov [#allocation7]   ;;  %s2725_s4 = sld [smem:[#allocation27_spill]] }
  0x18   : > { %p2360_p3 = pnand %p1688_p0, %p327_p2  ;;  %s340_s13 = sshll.u32 %s2251_s30, 4  ;;  %s341_s13 = int_to_ptr.vmem [resolvable:$true] %s340_s13 }
  0x19   : > { %s2252_s18 = smov [#allocation8]   ;;  %s2710_s20 = smov 128  }
  0x1a   : > { %p1790_p4 = pneg %p2360_p3  ;;  %s357_s19 = sshll.u32 %s2252_s18, 4  ;;  %s358_s19 = int_to_ptr.vmem [resolvable:$true] %s357_s19 }
  0x1b   : > { %s338_s27 = sshll.u32 %s2723_s2, 4  ;;  %s2711_s25 = smov 8   ;;  %s339_s27 = int_to_ptr.hbm [resolvable:$true] %s338_s27 }
  0x1c   : > { %p2372_p6 = pnand %p1790_p4, %p55_p1  ;;  %s2255_s26 = smov 256  }
  0x1d   : > { %s355_s16 = sshll.u32 %s2725_s4, 4  ;;  %s2256_s30 = smov 16   ;;  %s356_s16 = int_to_ptr.hbm [resolvable:$true] %s355_s16 }
  0x1e   : > { %1793 = dma.hbm_to_vmem [thread:$0]  (!%p2372_p6), %s339_s27, 2048, %s341_s13, [#allocation6], %s2710_s20, %s2710_s20, %s2711_s25  }
  0x1f   : > { %1796 = dma.hbm_to_vmem [thread:$0]  (!%p2372_p6), %s356_s16, 12288, %s358_s19, [#allocation9], %s2255_s26, %s2255_s26, %s2256_s30  }
  0x20   : > { %s2727_s6 = sld [smem:[#allocation29_spill]]  ;;  %s2257_s4 = smov [#allocation11]  }
  0x21   : > { %s385_s18 = sshll.u32 %s2257_s4, 4  ;;  %s2728_s5 = sld [smem:[#allocation28_spill]]  ;;  %s386_s18 = int_to_ptr.vmem [resolvable:$true] %s385_s18 }
  0x22   : > { %s2258_s27 = smov [#allocation10]   ;;  %s2729_s8 = sld [smem:[#allocation30_spill]] }
  0x23   : > { %s371_s13 = sshll.u32 %s2258_s27, 4  ;;  %s2730_s10 = sld [smem:[#allocation32_spill]]  ;;  %s372_s13 = int_to_ptr.vmem [resolvable:$true] %s371_s13 }
  0x24   : > { %s2259_s14 = smov [#allocation13]   ;;  %p48_p8 = scmp.ne.s32.totalorder %s2245_s23, %s2241_s22 }
  0x25   : > { %s402_s15 = sshll.u32 %s2259_s14, 4  ;;  %p49_p9 = scmp.eq.s32.totalorder %s2249_s24, 0  ;;  %s403_s15 = int_to_ptr.vmem [resolvable:$true] %s402_s15 }
  0x26   : > { %s383_s2 = sshll.u32 %s2727_s6, 4  ;;  %p54_p10 = scmp.ne.s32.totalorder %s2241_s22, %s2237_s21  ;;  %s384_s2 = int_to_ptr.hbm [resolvable:$true] %s383_s2 }
  0x27   : > { %s369_s9 = sshll.u32 %s2728_s5, 4  ;;  %p2427_p11 = por %p49_p9, %p48_p8  ;;  %s370_s9 = int_to_ptr.hbm [resolvable:$true] %s369_s9 }
  0x28   : > { %1802 = dma.hbm_to_vmem [thread:$0]  (!%p2372_p6), %s384_s2, 6144, %s386_s18, [#allocation12], %s2710_s20, %s2710_s20, %s2711_s25  }
  0x29   : > { %s400_s4 = sshll.u32 %s2729_s8, 4  ;;  %s417_s2 = sshll.u32 %s2730_s10, 4  ;;  %s401_s4 = int_to_ptr.hbm [resolvable:$true] %s400_s4  ;;  %s418_s2 = int_to_ptr.hbm [resolvable:$true] %s417_s2 }
  0x2a   : > { %1799 = dma.hbm_to_vmem [thread:$0]  (!%p2372_p6), %s370_s9, 12288, %s372_s13, [#allocation9], %s2255_s26, %s2255_s26, %s2256_s30  }
  0x2b   : > { %1805 = dma.hbm_to_vmem [thread:$0]  (!%p2372_p6), %s401_s4, 2048, %s403_s15, [#allocation12], %s2710_s20, %s2710_s20, %s2711_s25  }
  0x2c   : > { %s2260_s9 = smov [#allocation14]   ;;  %s1687_s30 = sadd.s32 4294967294, %s2249_s24  }
  0x2d   : > { %s419_s26 = sshll.u32 %s2260_s9, 4  ;;  %s2414_s18 = sadd.s32 1, %s2249_s24   ;;  %s420_s26 = int_to_ptr.vmem [resolvable:$true] %s419_s26 }
  0x2e   : > { %1808 = dma.hbm_to_vmem [thread:$0]  (!%p2372_p6), %s418_s2, 2048, %s420_s26, [#allocation15], %s2710_s20, %s2710_s20, %s2711_s25  }
  0x2f   : > { %s38_s27 = ssub.s32 %s2249_s24, %s2414_s18  ;;  %s41_s13 = sadd.s32 1, %s2245_s23 }
  0x30   : > { %p39_p7 = scmp.eq.s32.totalorder %s38_s27, 0  ;;  %p2433_p12 = por %p55_p1, %p54_p10 }
  0x31   : > { %p314_p13 = scmp.eq.s32.totalorder %s2355_s28, 1  ;;  %p320_p0 = scmp.eq.s32.totalorder %s1687_s30, 1 }
  0x32   : > { %s2425_s16 = scalar_select %p39_p7, %s2245_s23, %s41_s13  }
  0x33   : > { %p1826_p2 = scmp.lt.s32.totalorder %s2249_s24, 2  ;;  %s2440_s4 = sand.u32 1, %s2245_s23  }
  0x34   : > { %2731 = sst [smem:[#allocation25_spill]] %s2425_s16  ;;  %p2442_p4 = por %p314_p13, %p48_p8 }
  0x35   : > { %p2446_p6 = por %p320_p0, %p54_p10  ;;  %s1696_s2 = sshll.u32 %s2440_s4, 4 }
  0x36   : > { %s1724_s14 = sshll.u32 %s2249_s24, 4  ;;  %s440_s30 = scalar_lea.vmem [#allocation2], %s1696_s2 }
  0x37   : > { %s445_s26 = scalar_lea.hbm %s2696_s0, %s1724_s14  ;;  %s448_s27 = sshll.u32 %s440_s30, 4  ;;  %s449_s27 = int_to_ptr.vmem [resolvable:$true] %s448_s27 }
  0x38   : > { %s446_s13 = sshll.u32 %s445_s26, 4  ;;  %p2457_p7 = pnand %p1826_p2, %p2427_p11  ;;  %s447_s13 = int_to_ptr.hbm [resolvable:$true] %s446_s13 }
  0x39   : > { %s1758_s25 = smul.u32 6, %s2440_s4  ;;  %s458_s5 = sand.u32 1, %s2249_s24  }
  0x3a   : > { %s437_s6 = scalar_lea.sflag [#allocation3], %s2440_s4  ;;  %s2103_s8 = sshra.s32 %s447_s13, 4  ;;  %s2104_s8 = int_to_ptr.hbm [resolvable:$true] %s2103_s8 }
  0x3b   : > { %s2105_s10 = scalar_lea.hbm %s2104_s8, 16  ;;  %p2107_p9 = pneg %p2457_p7 }
  0x3c   : > { %p2106_p8 = scmp.ne.s32.totalorder %s2104_s8, %s2105_s10  ;;  %s2110_s14 = scalar_lea.hbm %s2696_s0, 32 }
  0x3d   : > { %p2111_p11 = scmp.lt.s32.totalorder %s2104_s8, %s2696_s0  ;;  %p2112_p0 = scmp.lt.s32.totalorder %s2110_s14, %s2105_s10 }
  0x3e   : > { %p2108_p10 = pnand %p2107_p9, %p2106_p8 }
  0x3f   : > { %p2113_p2 = por %p2112_p0, %p2111_p11 }
  0x40   : > { %p2109_p13 = pneg %p2108_p10 }
  0x42   : > { %p2114_p5 = pnand %p2113_p2, %p2109_p13 }
  0x44   : > { %2117 = shalt.err (!%p2114_p5)
}
  0x45   : > { %s2737_s4 = smov 8   ;;  %s2738_s26 = smov 128  }
  0x46   : > { %1812 = dma.hbm_to_vmem [thread:$0]  (!%p2457_p7), %s447_s13, 256, %s449_s27, %s437_s6, %s2738_s26, %s2738_s26, %s2737_s4  }
  0x47   : > { %s1699_s30 = sshll.u32 %s2249_s24, 1  ;;  %s462_s16 = scalar_lea.vmem [#allocation5], %s1758_s25 }
  0x48   : > { %s469_s17 = sshll.u32 %s462_s16, 4  ;;  %s466_s15 = scalar_lea.hbm %s2697_s1, %s1699_s30  ;;  %s470_s17 = int_to_ptr.vmem [resolvable:$true] %s469_s17 }
  0x49   : > { %s467_s8 = sshll.u32 %s466_s15, 4  ;;  %s459_s10 = scalar_lea.sflag [#allocation6], %s458_s5  ;;  %s468_s8 = int_to_ptr.hbm [resolvable:$true] %s467_s8 }
  0x4a   : > { %s2133_s14 = sshra.s32 %s468_s8, 4  ;;  %s2140_s25 = scalar_lea.hbm %s2697_s1, 12  ;;  %s2134_s14 = int_to_ptr.hbm [resolvable:$true] %s2133_s14 }
  0x4b   : > { %s2135_s9 = scalar_lea.hbm %s2134_s14, 6  ;;  %p2141_p13 = scmp.lt.s32.totalorder %s2134_s14, %s2697_s1 }
  0x4c   : > { %p2136_p5 = scmp.ne.s32.totalorder %s2134_s14, %s2135_s9  ;;  %p2142_p11 = scmp.lt.s32.totalorder %s2140_s25, %s2135_s9 }
  0x4e   : > { %p2138_p8 = pnand %p2136_p5, %p2107_p9  ;;  %p2143_p0 = por %p2142_p11, %p2141_p13 }
  0x50   : > { %p2139_p10 = pneg %p2138_p8 }
  0x52   : > { %p2144_p2 = pnand %p2143_p0, %p2139_p10 }
  0x54   : > { %2147 = shalt.err (!%p2144_p2)
}
  0x55   : > { %s2261_s5 = smov 64   ;;  %s2262_s23 = smov 32  }
  0x56   : > { %s2263_s4 = smov 2   ;;  %481 = sbr.rel (%p2360_p3) target bundleno = 1471 (0x5bf), region = 68 }
  0x57   : > { %1815 = dma.hbm_to_vmem [thread:$0]  (!%p2457_p7), %s468_s8, 96, %s470_s17, %s459_s10, %s2261_s5, %s2262_s23, %s2263_s4  }
  0x58   : > { %s2498_s26 = sand.u32 (!%p2360_p3), 1, %s2241_s22  }
  0x59   : > { %s1701_s30 = sshll.u32 (!%p2360_p3), %s2498_s26, 4  ;;  %s484_s2 = scalar_lea.sflag (!%p2360_p3), [#allocation3], %s2498_s26 }
  0x5a   : > { %s2504_s15 = scalar_lea.vmem (!%p2360_p3), [#allocation2], %s1701_s30 }
  0x5b   : > { %2208 = dma.done.wait (%p2433_p12), %s484_s2, 256  }
  0x5c   : > { %2210 = vsyncadd (%p2433_p12), %s484_s2, 4294967040  ;;  %s493_s29 = sand.u32 1, %s2355_s28   ;;  %s1759_s20 = smul.u32 6, %s2498_s26 }
  0x5d   : > { %s494_s17 = scalar_lea.sflag [#allocation6], %s493_s29 }
  0x5e   : > { %s2512_s8 = scalar_lea.vmem [#allocation5], %s1759_s20 }
  0x5f   : > { %2212 = dma.done.wait (%p2433_p12), %s494_s17, 96  }
  0x60   : > { %2214 = vsyncadd (%p2433_p12), %s494_s17, 4294967200 }
  0x61   : > { %2216 = dma.done.wait (%p55_p1), [#allocation6], 2048  }
  0x62   : > { %2218 = vsyncadd (%p55_p1), [#allocation6], 4294965248 }
  0x63   : > { %2220 = dma.done.wait (%p55_p1), [#allocation9], 24576  }
  0x64   : > { %2222 = vsyncadd (%p55_p1), [#allocation9], 4294942720 }
  0x65   : > { %2224 = dma.done.wait (%p55_p1), [#allocation12], 8192  }
  0x66   : > { %2226 = vsyncadd (%p55_p1), [#allocation12], 4294959104 }
  0x67   : > { %2228 = dma.done.wait (%p55_p1), [#allocation15], 2048  }
  0x68   : > { %2230 = vsyncadd (%p55_p1), [#allocation15], 4294965248  ;;  %v591_v0 = vld [vmem:[#allocation7 + $0x78] sm:$0xff]  ;;  %v590_v1 = vld [vmem:[#allocation7 + $0x70] sm:$0xff]  ;;  %vm623_vm0 = vcmask 1040384   ;;  %vm888_vm9 = vcmask 1041408  }
  0x69   : > { %596 = vmatpush.msra.mxu0 %v591_v0  ;;  %v589_v2 = vld [vmem:[#allocation7 + $0x68] sm:$0xff]  ;;  %v588_v3 = vld [vmem:[#allocation7 + $0x60] sm:$0xff]  ;;  %v587_v4 = vld [vmem:[#allocation7 + $0x58] sm:$0xff]  ;;  %s2739_s23 = sld [smem:[#allocation31_spill]]  ;;  %s573_s29 = scalar_lea.vmem [#allocation16], %s1701_s30 }
  0x6a   : > { %v586_v5 = vld [vmem:[#allocation7 + $0x50] sm:$0xff]  ;;  %v692_v7 = vld [vmem:[#allocation10 + $0xf8] sm:$0xff]  ;;  %v689_v8 = vld [vmem:[#allocation10 + $0xe0] sm:$0xff]  ;;  %s1725_s20 = sshll.u32 %s2355_s28, 4  ;;  %s2741_s19 = sld [smem:[#allocation34_spill]] }
  0x6b   : > { %597 = vmatpush.msra.mxu0 %v590_v1  ;;  %v691_v6 = vld [vmem:[#allocation10 + $0xf0] sm:$0xff]  ;;  %v690_v9 = vld [vmem:[#allocation10 + $0xe8] sm:$0xff]  ;;  %716 = vmatpush.msra.mxu2 %v692_v7  ;;  %v688_v12 = vld [vmem:[#allocation10 + $0xd8] sm:$0xff]  ;;  %s1531_s14 = sshll.u32 %s573_s29, 4  ;;  %s1519_s6 = scalar_lea.sflag [#allocation4], %s2498_s26  ;;  %s1532_s14 = int_to_ptr.vmem [resolvable:$true] %s1531_s14 }
  0x6c   : > { %693 = vmatpush.msra.mxu1 %v691_v6  ;;  %v585_v10 = vld [vmem:[#allocation7 + $0x48] sm:$0xff]  ;;  %v687_v11 = vld [vmem:[#allocation10 + $0xd0] sm:$0xff]  ;;  %v584_v13 = vld [vmem:[#allocation7 + $0x40] sm:$0xff] }
  0x6d   : > { %598 = vmatpush.msra.mxu0 %v589_v2  ;;  %717 = vmatpush.msra.mxu2 %v690_v9  ;;  %v685_v14 = vld [vmem:[#allocation10 + $0xc0] sm:$0xff]  ;;  %v659_v15 = vld [vmem:[#allocation8 + $0xf0] sm:$0xff]  ;;  %v686_v16 = vld [vmem:[#allocation10 + $0xc8] sm:$0xff] }
  0x6e   : > { %694 = vmatpush.msra.mxu1 %v689_v8  ;;  %v657_v17 = vld [vmem:[#allocation8 + $0xe0] sm:$0xff]  ;;  %v583_v18 = vld [vmem:[#allocation7 + $0x38] sm:$0xff]  ;;  %v683_v19 = vld [vmem:[#allocation10 + $0xb0] sm:$0xff]  ;;  %739 = vmatpush.msra.mxu3 %v659_v15 }
  0x6f   : > { %599 = vmatpush.msra.mxu0 %v588_v3  ;;  %718 = vmatpush.msra.mxu2 %v688_v12  ;;  %v684_v20 = vld [vmem:[#allocation10 + $0xb8] sm:$0xff]  ;;  %v655_v21 = vld [vmem:[#allocation8 + $0xd0] sm:$0xff]  ;;  %v681_v23 = vld [vmem:[#allocation10 + $0xa0] sm:$0xff] }
  0x70   : > { %695 = vmatpush.msra.mxu1 %v687_v11  ;;  %v582_v22 = vld [vmem:[#allocation7 + $0x30] sm:$0xff]  ;;  %740 = vmatpush.msra.mxu3 %v657_v17  ;;  %v682_v24 = vld [vmem:[#allocation10 + $0xa8] sm:$0xff]  ;;  %v653_v25 = vld [vmem:[#allocation8 + $0xc0] sm:$0xff]  ;;  %s1530_s10 = scalar_lea.hbm %s2741_s19, %s1725_s20  ;;  %s2183_s16 = scalar_lea.hbm %s2741_s19, 32 }
  0x71   : > { %600 = vmatpush.msra.mxu0 %v587_v4  ;;  %719 = vmatpush.msra.mxu2 %v686_v16  ;;  %v581_v26 = vld [vmem:[#allocation7 + $0x28] sm:$0xff]  ;;  %v679_v27 = vld [vmem:[#allocation10 + $0x90] sm:$0xff]  ;;  %v680_v28 = vld [vmem:[#allocation10 + $0x98] sm:$0xff]  ;;  %s1533_s9 = sshll.u32 %s1530_s10, 4  ;;  %s1534_s9 = int_to_ptr.hbm [resolvable:$true] %s1533_s9 }
  0x72   : > { %696 = vmatpush.msra.mxu1 %v685_v14  ;;  %741 = vmatpush.msra.mxu3 %v655_v21  ;;  %v651_v29 = vld [vmem:[#allocation8 + $0xb0] sm:$0xff]  ;;  %v580_v30 = vld [vmem:[#allocation7 + $0x20] sm:$0xff]  ;;  %v678_v32 = vld [vmem:[#allocation10 + $0x88] sm:$0xff]  ;;  %s2177_s27 = sshra.s32 %s1534_s9, 4  ;;  %s2178_s27 = int_to_ptr.hbm [resolvable:$true] %s2177_s27 }
  0x73   : > { %601 = vmatpush.msra.mxu0 %v586_v5  ;;  %720 = vmatpush.msra.mxu2 %v684_v20  ;;  %v677_v31 = vld [vmem:[#allocation10 + $0x80] sm:$0xff]  ;;  %v579_v34 = vld [vmem:[#allocation7 + $0x18] sm:$0xff]  ;;  %v675_v35 = vld [vmem:[#allocation10 + $0x70] sm:$0xff]  ;;  %s2179_s25 = scalar_lea.hbm %s2178_s27, 16  ;;  %p2184_p7 = scmp.lt.s32.totalorder %s2178_s27, %s2741_s19 }
  0x74   : > { %697 = vmatpush.msra.mxu1 %v683_v19  ;;  %742 = vmatpush.msra.mxu3 %v653_v25  ;;  %v649_v33 = vld [vmem:[#allocation8 + $0xa0] sm:$0xff]  ;;  %v676_v36 = vld [vmem:[#allocation10 + $0x78] sm:$0xff]  ;;  %v647_v37 = vld [vmem:[#allocation8 + $0x90] sm:$0xff]  ;;  %p2180_p1 = scmp.ne.s32.totalorder %s2178_s27, %s2179_s25  ;;  %p2185_p9 = scmp.lt.s32.totalorder %s2183_s16, %s2179_s25 }
  0x75   : > { %602 = vmatpush.msra.mxu0 %v585_v10  ;;  %721 = vmatpush.msra.mxu2 %v682_v24  ;;  %v578_v38 = vld [vmem:[#allocation7 + $0x10] sm:$0xff]  ;;  %v673_v39 = vld [vmem:[#allocation10 + $0x60] sm:$0xff]  ;;  %v674_v40 = vld [vmem:[#allocation10 + $0x68] sm:$0xff] }
  0x76   : > { %698 = vmatpush.msra.mxu1 %v681_v23  ;;  %743 = vmatpush.msra.mxu3 %v651_v29  ;;  %v645_v41 = vld [vmem:[#allocation8 + $0x80] sm:$0xff]  ;;  %v577_v42 = vld [vmem:[#allocation7 + $0x8] sm:$0xff]  ;;  %v671_v43 = vld [vmem:[#allocation10 + $0x50] sm:$0xff]  ;;  %p2181_p3 = pnand %p2180_p1, %p2442_p4  ;;  %p2186_p5 = por %p2185_p9, %p2184_p7 }
  0x77   : > { %603 = vmatpush.msra.mxu0 %v584_v13  ;;  %722 = vmatpush.msra.mxu2 %v680_v28  ;;  %v672_v44 = vld [vmem:[#allocation10 + $0x58] sm:$0xff]  ;;  %v643_v45 = vld [vmem:[#allocation8 + $0x70] sm:$0xff]  ;;  %v576_v46 = vld [vmem:[#allocation7] sm:$0xff] }
  0x78   : > { %699 = vmatpush.msra.mxu1 %v679_v27  ;;  %744 = vmatpush.msra.mxu3 %v649_v33  ;;  %v669_v47 = vld [vmem:[#allocation10 + $0x40] sm:$0xff]  ;;  %v670_v49 = vld [vmem:[#allocation10 + $0x48] sm:$0xff]  ;;  %v660_v50 = vld [vmem:[#allocation8 + $0xf8] sm:$0xff]  ;;  %p2182_p12 = pneg %p2181_p3 }
  0x79   : > { %604 = vmatpush.msra.mxu0 %v583_v18  ;;  %723 = vmatpush.msra.mxu2 %v678_v32  ;;  %v574_v48 = vld [vmem:[%s2504_s15] sm:$0xff]  ;;  %v575_v58 = vld [vmem:[%s2504_s15 + $0x8] sm:$0xff]  ;;  %s2740_s15 = sld [smem:[#allocation33_spill]] }
  0x7a   : > { %700 = vmatpush.msra.mxu1 %v677_v31  ;;  %745 = vmatpush.msra.mxu3 %v647_v37  ;;  %v667_v51 = vld [vmem:[#allocation10 + $0x30] sm:$0xff]  ;;  %v668_v52 = vld [vmem:[#allocation10 + $0x38] sm:$0xff]  ;;  %v658_v53 = vld [vmem:[#allocation8 + $0xe8] sm:$0xff]  ;;  %p2187_p8 = pnand %p2186_p5, %p2182_p12 }
  0x7b   : > { %605 = vmatpush.msra.mxu0 %v582_v22  ;;  %724 = vmatpush.msra.mxu2 %v676_v36  ;;  %v665_v54 = vld [vmem:[#allocation10 + $0x20] sm:$0xff]  ;;  %v666_v55 = vld [vmem:[#allocation10 + $0x28] sm:$0xff]  ;;  %v656_v56 = vld [vmem:[#allocation8 + $0xd8] sm:$0xff] }
  0x7c   : > { %701 = vmatpush.msra.mxu1 %v675_v35  ;;  %746 = vmatpush.msra.mxu3 %v645_v41  ;;  %v654_v57 = vld [vmem:[#allocation8 + $0xc8] sm:$0xff]  ;;  %v652_v59 = vld [vmem:[#allocation8 + $0xb8] sm:$0xff]  ;;  %v663_v0 = vld [vmem:[#allocation10 + $0x10] sm:$0xff] }
  0x7d   : > { %606 = vmatpush.msra.mxu0 %v581_v26  ;;  %725 = vmatpush.msra.mxu2 %v674_v40  ;;  %v650_v60 = vld [vmem:[#allocation8 + $0xa8] sm:$0xff]  ;;  %v648_v61 = vld [vmem:[#allocation8 + $0x98] sm:$0xff]  ;;  %v641_v2 = vld [vmem:[#allocation8 + $0x60] sm:$0xff] }
  0x7e   : > { %702 = vmatpush.msra.mxu1 %v673_v39  ;;  %747 = vmatpush.msra.mxu3 %v643_v45  ;;  %v646_v62 = vld [vmem:[#allocation8 + $0x88] sm:$0xff]  ;;  %v644_v63 = vld [vmem:[#allocation8 + $0x78] sm:$0xff]  ;;  %v661_v4 = vld [vmem:[#allocation10] sm:$0xff] }
  0x7f   : > { %607 = vmatpush.msra.mxu0 %v580_v30  ;;  %726 = vmatpush.msra.mxu2 %v672_v44  ;;  %v664_v1 = vld [vmem:[#allocation10 + $0x18] sm:$0xff]  ;;  %v642_v3 = vld [vmem:[#allocation8 + $0x68] sm:$0xff]  ;;  %v639_v6 = vld [vmem:[#allocation8 + $0x50] sm:$0xff] }
  0x80   : > { %703 = vmatpush.msra.mxu1 %v671_v43  ;;  %748 = vmatpush.msra.mxu3 %v641_v2  ;;  %v662_v5 = vld [vmem:[#allocation10 + $0x8] sm:$0xff]  ;;  %v640_v7 = vld [vmem:[#allocation8 + $0x58] sm:$0xff]  ;;  %v637_v8 = vld [vmem:[#allocation8 + $0x40] sm:$0xff] }
  0x81   : > { %608 = vmatpush.msra.mxu0 %v579_v34  ;;  %727 = vmatpush.msra.mxu2 %v670_v49  ;;  %v638_v9 = vld [vmem:[#allocation8 + $0x48] sm:$0xff]  ;;  %v635_v10 = vld [vmem:[#allocation8 + $0x30] sm:$0xff]  ;;  %v636_v11 = vld [vmem:[#allocation8 + $0x38] sm:$0xff] }
  0x82   : > { %704 = vmatpush.msra.mxu1 %v669_v47  ;;  %749 = vmatpush.msra.mxu3 %v639_v6  ;;  %v633_v12 = vld [vmem:[#allocation8 + $0x20] sm:$0xff]  ;;  %v634_v13 = vld [vmem:[#allocation8 + $0x28] sm:$0xff]  ;;  %v631_v14 = vld [vmem:[#allocation8 + $0x10] sm:$0xff] }
  0x83   : > { %609 = vmatpush.msra.mxu0 %v578_v38  ;;  %728 = vmatpush.msra.mxu2 %v668_v52  ;;  %v632_v15 = vld [vmem:[#allocation8 + $0x18] sm:$0xff]  ;;  %v629_v16 = vld [vmem:[#allocation8] sm:$0xff]  ;;  %v630_v17 = vld [vmem:[#allocation8 + $0x8] sm:$0xff] }
  0x84   : > { %705 = vmatpush.msra.mxu1 %v667_v51  ;;  %750 = vmatpush.msra.mxu3 %v637_v8  ;;  %v1881_v18 = vld [vmem:[%s2699_s3] ss:$0 sm:$0xff]  ;;  %v852_v27 = vld [vmem:[#allocation11 + $0x78] sm:$0xff]  ;;  %v850_v29 = vld [vmem:[#allocation11 + $0x68] sm:$0xff] }
  0x85   : > { %610 = vmatpush.msra.mxu0 %v577_v42  ;;  %729 = vmatpush.msra.mxu2 %v666_v55  ;;  %v851_v28 = vld [vmem:[#allocation11 + $0x70] sm:$0xff]  ;;  %v849_v30 = vld [vmem:[#allocation11 + $0x60] sm:$0xff]  ;;  %v848_v31 = vld [vmem:[#allocation11 + $0x58] sm:$0xff] }
  0x86   : > { %706 = vmatpush.msra.mxu1 %v665_v54  ;;  %751 = vmatpush.msra.mxu3 %v635_v10  ;;  %v847_v32 = vld [vmem:[#allocation11 + $0x50] sm:$0xff]  ;;  %v846_v33 = vld [vmem:[#allocation11 + $0x48] sm:$0xff]  ;;  %v845_v34 = vld [vmem:[#allocation11 + $0x40] sm:$0xff] }
  0x87   : > { %611 = vmatpush.msra.mxu0 %v576_v46  ;;  %730 = vmatpush.msra.mxu2 %v664_v1  ;;  %v844_v35 = vld [vmem:[#allocation11 + $0x38] sm:$0xff]  ;;  %v843_v36 = vld [vmem:[#allocation11 + $0x30] sm:$0xff]  ;;  %v842_v37 = vld [vmem:[#allocation11 + $0x28] sm:$0xff] }
  0x88   : > { %612 = vmatmul.f32.vlgmr.msra.gmra.mxu0 %v574_v48  ;;  %707 = vmatpush.msra.mxu1 %v663_v0  ;;  %v841_v38 = vld [vmem:[#allocation11 + $0x20] sm:$0xff]  ;;  %v840_v39 = vld [vmem:[#allocation11 + $0x18] sm:$0xff]  ;;  %v839_v40 = vld [vmem:[#allocation11 + $0x10] sm:$0xff] }
  0x89   : > { %762 = vmatpush.msrb.mxu0 %v660_v50  ;;  %731 = vmatpush.msra.mxu2 %v662_v5  ;;  %v2550_v41 = vld [vmem:[%s2512_s8] sm:$0x3]  ;;  %v838_v42 = vld [vmem:[#allocation11 + $0x8] sm:$0xff]  ;;  %v837_v45 = vld [vmem:[#allocation11] sm:$0xff] }
  0x8a   : > { %708 = vmatpush.msra.mxu1 %v661_v4  ;;  %752 = vmatpush.msra.mxu3 %v633_v12  ;;  %v788_v44 = vperm.slane %v2550_v41, 1  ;;  %v958_v54 = vld [vmem:[#allocation10 + $0x1f0] sm:$0xff]  ;;  %v959_v55 = vld [vmem:[#allocation10 + $0x1f8] sm:$0xff]  ;;  %v952_v0 = vld [vmem:[#allocation10 + $0x1c0] sm:$0xff]  ;;  %v787_v10 = vperm.slane %v2550_v41, 0 }
  0x8b   : > { %763 = vmatpush.msrb.mxu0 %v658_v53  ;;  %960 = vmatpush.msrb.mxu2 %v958_v54  ;;  %v953_v2 = vld [vmem:[#allocation10 + $0x1c8] sm:$0xff]  ;;  %v926_v4 = vld [vmem:[#allocation8 + $0x1f8] sm:$0xff]  ;;  %v923_v5 = vld [vmem:[#allocation8 + $0x1e0] sm:$0xff] }
  0x8c   : > { %753 = vmatpush.msra.mxu3 %v631_v14  ;;  %853 = vmatpush.msrb.mxu1 %v852_v27  ;;  %v924_v6 = vld [vmem:[#allocation8 + $0x1e8] sm:$0xff]  ;;  %v951_v8 = vld [vmem:[#allocation10 + $0x1b8] sm:$0xff] }
  0x8d   : > { %764 = vmatpush.msrb.mxu0 %v656_v56  ;;  %v956_v56 = vld [vmem:[#allocation10 + $0x1e0] sm:$0xff]  ;;  %v922_v12 = vld [vmem:[#allocation8 + $0x1d8] sm:$0xff]  ;;  %v949_v14 = vld [vmem:[#allocation10 + $0x1a8] sm:$0xff] }
  0x8e   : > { %754 = vmatpush.msra.mxu3 %v629_v16  ;;  %854 = vmatpush.msrb.mxu1 %v851_v28  ;;  %v920_v16 = vld [vmem:[#allocation8 + $0x1c8] sm:$0xff] }
  0x8f   : > { %765 = vmatpush.msrb.mxu0 %v654_v57  ;;  %v957_v57 = vld [vmem:[#allocation10 + $0x1e8] sm:$0xff]  ;;  %961 = vmatpush.msrb.mxu2 %v956_v56  ;;  %v936_v56 = vld [vmem:[#allocation10 + $0x140] sm:$0xff] }
  0x90   : > { %615 = vmatmul.f32.gmra.mxu0 %v575_v58  ;;  %855 = vmatpush.msrb.mxu1 %v850_v29  ;;  %v944_v29 = vld [vmem:[#allocation10 + $0x180] sm:$0xff] }
  0x91   : > { %766 = vmatpush.msrb.mxu0 %v652_v59  ;;  %983 = vmatpush.msrb.mxu3 %v959_v55 }
  0x92   : > { %856 = vmatpush.msrb.mxu1 %v849_v30  ;;  %v945_v30 = vld [vmem:[#allocation10 + $0x188] sm:$0xff] }
  0x93   : > { %767 = vmatpush.msrb.mxu0 %v650_v60  ;;  %984 = vmatpush.msrb.mxu3 %v957_v57  ;;  %v937_v57 = vld [vmem:[#allocation10 + $0x148] sm:$0xff] }
  0x94   : > { %857 = vmatpush.msrb.mxu1 %v848_v31  ;;  %v915_v31 = vld [vmem:[#allocation8 + $0x1a0] sm:$0xff] }
  0x95   : > { %768 = vmatpush.msrb.mxu0 %v648_v61  ;;  %v954_v61 = vld [vmem:[#allocation10 + $0x1d0] sm:$0xff] }
  0x96   : > { %858 = vmatpush.msrb.mxu1 %v847_v32  ;;  %962 = vmatpush.msrb.mxu2 %v954_v61  ;;  %v916_v32 = vld [vmem:[#allocation8 + $0x1a8] sm:$0xff]  ;;  %v934_v61 = vld [vmem:[#allocation10 + $0x130] sm:$0xff] }
  0x97   : > { %769 = vmatpush.msrb.mxu0 %v646_v62  ;;  %v955_v62 = vld [vmem:[#allocation10 + $0x1d8] sm:$0xff] }
  0x98   : > { %859 = vmatpush.msrb.mxu1 %v846_v33  ;;  %985 = vmatpush.msrb.mxu3 %v955_v62  ;;  %v935_v62 = vld [vmem:[#allocation10 + $0x138] sm:$0xff] }
  0x99   : > { %770 = vmatpush.msrb.mxu0 %v644_v63  ;;  %963 = vmatpush.msrb.mxu2 %v952_v0 }
  0x9a   : > { %860 = vmatpush.msrb.mxu1 %v845_v34  ;;  %986 = vmatpush.msrb.mxu3 %v953_v2 }
  0x9b   : > { %771 = vmatpush.msrb.mxu0 %v642_v3  ;;  %v925_v3 = vld [vmem:[#allocation8 + $0x1f0] sm:$0xff] }
  0x9c   : > { %861 = vmatpush.msrb.mxu1 %v844_v35  ;;  %987 = vmatpush.msrb.mxu3 %v951_v8  ;;  %v942_v35 = vld [vmem:[#allocation10 + $0x170] sm:$0xff]  ;;  %v932_v8 = vld [vmem:[#allocation10 + $0x120] sm:$0xff] }
  0x9d   : > { %772 = vmatpush.msrb.mxu0 %v640_v7  ;;  %v950_v7 = vld [vmem:[#allocation10 + $0x1b0] sm:$0xff] }
  0x9e   : > { %862 = vmatpush.msrb.mxu1 %v843_v36  ;;  %964 = vmatpush.msrb.mxu2 %v950_v7  ;;  %v943_v36 = vld [vmem:[#allocation10 + $0x178] sm:$0xff] }
  0x9f   : > { %773 = vmatpush.msrb.mxu0 %v638_v9  ;;  %988 = vmatpush.msrb.mxu3 %v949_v14  ;;  %v907_v14 = vld [vmem:[#allocation8 + $0x160] sm:$0xff] }
  0xa0   : > { %863 = vmatpush.msrb.mxu1 %v842_v37 }
  0xa1   : > { %774 = vmatpush.msrb.mxu0 %v636_v11  ;;  %v921_v11 = vld [vmem:[#allocation8 + $0x1d0] sm:$0xff] }
  0xa2   : > { %864 = vmatpush.msrb.mxu1 %v841_v38 }
  0xa3   : > { %775 = vmatpush.msrb.mxu0 %v634_v13  ;;  %v948_v13 = vld [vmem:[#allocation10 + $0x1a0] sm:$0xff] }
  0xa4   : > { %865 = vmatpush.msrb.mxu1 %v840_v39  ;;  %965 = vmatpush.msrb.mxu2 %v948_v13  ;;  %v913_v39 = vld [vmem:[#allocation8 + $0x190] sm:$0xff]  ;;  %v931_v13 = vld [vmem:[#allocation10 + $0x118] sm:$0xff] }
  0xa5   : > { %776 = vmatpush.msrb.mxu0 %v632_v15  ;;  %v919_v15 = vld [vmem:[#allocation8 + $0x1c0] sm:$0xff] }
  0xa6   : > { %866 = vmatpush.msrb.mxu1 %v839_v40  ;;  %v914_v40 = vld [vmem:[#allocation8 + $0x198] sm:$0xff] }
  0xa7   : > { %777 = vmatpush.msrb.mxu0 %v630_v17 }
  0xa8   : > { %867 = vmatpush.msrb.mxu1 %v838_v42 }
  0xa9   : > { %1006 = vmatpush.msra.mxu0 %v925_v3 }
  0xaa   : > { %868 = vmatpush.msrb.mxu1 %v837_v45  ;;  %v941_v45 = vld [vmem:[#allocation10 + $0x168] sm:$0xff] }
  0xab   : > { %1007 = vmatpush.msra.mxu0 %v923_v5 }
  0xad   : > { %1008 = vmatpush.msra.mxu0 %v921_v11  ;;  %v910_v11 = vld [vmem:[#allocation8 + $0x178] sm:$0xff] }
  0xaf   : > { %1009 = vmatpush.msra.mxu0 %v919_v15  ;;  %v908_v15 = vld [vmem:[#allocation8 + $0x168] sm:$0xff] }
 0x105   : > { %v613_v19 = vpop.f32.mrf.mxu0 }
 0x106   : > { %v2539_v20 = vadd.f32 %v1881_v18, %v613_v19  ;;  %v947_v19 = vld [vmem:[#allocation10 + $0x198] sm:$0xff] }
 0x107   : > { %989 = vmatpush.msrb.mxu3 %v947_v19  ;;  %v906_v19 = vld [vmem:[#allocation8 + $0x158] sm:$0xff] }
 0x108   : > { %709 = vmatmul.f32.vlgmr.msra.gmra.mxu1 %v2539_v20  ;;  %732 = vmatmul.f32.vlgmr.msra.gmra.mxu2 %v2539_v20  ;;  %v624_v24 = vrot.slane %v2539_v20, 7 }
 0x109   : > { %1029 = vmatpush.msra.mxu1 %v926_v4  ;;  %990 = vmatpush.msrb.mxu3 %v945_v30  ;;  %v895_v30 = vld [vmem:[#allocation8 + $0x100] sm:$0xff] }
 0x10b   : > { %1030 = vmatpush.msra.mxu1 %v924_v6  ;;  %991 = vmatpush.msrb.mxu3 %v943_v36 }
 0x10d   : > { %v616_v21 = vpop.f32.mrf.mxu0  ;;  %1031 = vmatpush.msra.mxu1 %v922_v12  ;;  %992 = vmatpush.msrb.mxu3 %v941_v45  ;;  %v930_v12 = vld [vmem:[#allocation10 + $0x110] sm:$0xff] }
 0x10e   : > { %v2543_v22 = vadd.f32 %v1881_v18, %v616_v21  ;;  %v946_v18 = vld [vmem:[#allocation10 + $0x190] sm:$0xff] }
 0x10f   : > { %1032 = vmatpush.msra.mxu1 %v920_v16  ;;  %966 = vmatpush.msrb.mxu2 %v946_v18  ;;  %v928_v16 = vld [vmem:[#allocation10 + $0x100] sm:$0xff]  ;;  %v905_v18 = vld [vmem:[#allocation8 + $0x150] sm:$0xff] }
 0x110   : > { %712 = vmatmul.f32.gmra.mxu1 %v2543_v22  ;;  %735 = vmatmul.f32.gmra.mxu2 %v2543_v22  ;;  %v620_v23 = vrot.slane %v2543_v22, 7  ;;  %v1120_v45 = vld [vmem:[#allocation11 + $0xf0] sm:$0xff] }
 0x111   : > { %967 = vmatpush.msrb.mxu2 %v944_v29  ;;  %v898_v29 = vld [vmem:[#allocation8 + $0x118] sm:$0xff] }
 0x112   : > { %v628_v25 = vsel %vm623_vm0, %v620_v23, %v624_v24  ;;  %v625_v26 = vsel %vm623_vm0, %v624_v24, %v620_v23 }
 0x113   : > { %755 = vmatmul.f32.vlgmr.msra.gmra.mxu3 %v628_v25  ;;  %778 = vmatmul.f32.vlgmr.msrb.gmra.mxu0 %v628_v25  ;;  %v917_v25 = vld [vmem:[#allocation8 + $0x1b0] sm:$0xff] }
 0x114   : > { %1010 = vmatpush.msra.mxu0 %v917_v25  ;;  %968 = vmatpush.msrb.mxu2 %v942_v35  ;;  %v902_v25 = vld [vmem:[#allocation8 + $0x138] sm:$0xff] }
 0x116   : > { %1011 = vmatpush.msra.mxu0 %v915_v31  ;;  %v896_v31 = vld [vmem:[#allocation8 + $0x108] sm:$0xff] }
 0x118   : > { %1012 = vmatpush.msra.mxu0 %v913_v39 }
 0x11b   : > { %758 = vmatmul.f32.gmra.mxu3 %v625_v26  ;;  %781 = vmatmul.f32.gmra.mxu0 %v625_v26  ;;  %v918_v26 = vld [vmem:[#allocation8 + $0x1b8] sm:$0xff] }
 0x11c   : > { %1033 = vmatpush.msra.mxu1 %v918_v26  ;;  %v899_v26 = vld [vmem:[#allocation8 + $0x120] sm:$0xff] }
 0x11e   : > { %1034 = vmatpush.msra.mxu1 %v916_v32  ;;  %v1882_v32 = vld [vmem:[%s2703_s7] ss:$0 sm:$0xff] }
 0x120   : > { %1035 = vmatpush.msra.mxu1 %v914_v40 }
 0x185   : > { %v710_v1 = vpop.f32.mrf.mxu1 }
 0x18b   : > { %v733_v43 = vpop.f32.mrf.mxu2 }
 0x18d   : > { %v713_v33 = vpop.f32.mrf.mxu1 }
 0x190   : > { %v779_v46 = vpop.f32.mrf.mxu0 }
 0x191   : > { %v780_v47 = vadd.f32 %v779_v46, %v733_v43  ;;  %v911_v46 = vld [vmem:[#allocation8 + $0x180] sm:$0xff] }
 0x192   : > { %1013 = vmatpush.msra.mxu0 %v911_v46  ;;  %v1119_v46 = vld [vmem:[#allocation11 + $0xe8] sm:$0xff] }
 0x193   : > { %v792_v48 = vadd.f32 %v788_v44, %v780_v47  ;;  %v736_v50 = vpop.f32.mrf.mxu2  ;;  %v912_v47 = vld [vmem:[#allocation8 + $0x188] sm:$0xff] }
 0x194   : > { %1036 = vmatpush.msra.mxu1 %v912_v47  ;;  %v1118_v47 = vld [vmem:[#allocation11 + $0xe0] sm:$0xff] }
 0x195   : > { %v1709_v49 = vmul.f32 -1.442695, %v792_v48 }
 0x196   : > { %v756_v59 = vpop.f32.mrf.mxu3  ;;  %1037 = vmatpush.msra.mxu1 %v910_v11 }
 0x197   : > { %1887 = vpow2.f32 %v1709_v49  ;;  %v757_v9 = vadd.f32 %v756_v59, %v710_v1  ;;  %v938_v49 = vld [vmem:[#allocation10 + $0x150] sm:$0xff] }
 0x198   : > { %v782_v51 = vpop.f32.mrf.mxu0  ;;  %1038 = vmatpush.msra.mxu1 %v908_v15 }
 0x199   : > { %v783_v52 = vadd.f32 %v782_v51, %v736_v50  ;;  %v791_v23 = vadd.f32 %v787_v10, %v757_v9  ;;  %v939_v50 = vld [vmem:[#allocation10 + $0x158] sm:$0xff]  ;;  %v933_v9 = vld [vmem:[#allocation10 + $0x128] sm:$0xff] }
 0x19a   : > { %993 = vmatpush.msrb.mxu3 %v939_v50  ;;  %1039 = vmatpush.msra.mxu1 %v906_v19  ;;  %v1115_v50 = vld [vmem:[#allocation11 + $0xc8] sm:$0xff]  ;;  %v1195_v19 = vld [vmem:[#allocation8 + $0x2f0] sm:$0xff] }
 0x19b   : > { %v794_v53 = vadd.f32 %v788_v44, %v783_v52  ;;  %v940_v44 = vld [vmem:[#allocation10 + $0x160] sm:$0xff] }
 0x19c   : > { %969 = vmatpush.msrb.mxu2 %v940_v44  ;;  %994 = vmatpush.msrb.mxu3 %v937_v57  ;;  %v1121_v44 = vld [vmem:[#allocation11 + $0xf8] sm:$0xff]  ;;  %v1108_v57 = vld [vmem:[#allocation11 + $0x90] sm:$0xff] }
 0x19d   : > { %v1888_v58 = vpop.eup %1887  ;;  %v1710_v60 = vmul.f32 -1.442695, %v794_v53 }
 0x19e   : > { %v2553_v63 = vadd.f32 1.0, %v1888_v58  ;;  %v759_v27 = vpop.f32.mrf.mxu3  ;;  %970 = vmatpush.msrb.mxu2 %v938_v49  ;;  %995 = vmatpush.msrb.mxu3 %v935_v62  ;;  %v1116_v49 = vld [vmem:[#allocation11 + $0xd0] sm:$0xff] }
 0x19f   : > { %1889 = vpow2.f32 %v1710_v60  ;;  %v760_v37 = vadd.f32 %v759_v27, %v713_v33  ;;  %v900_v27 = vld [vmem:[#allocation8 + $0x128] sm:$0xff] }
 0x1a0   : > { %1891 = vrcp.f32 %v2553_v63  ;;  %v816_v38 = vand.u32 2147483648, %v2553_v63  ;;  %v814_v43 = vand.u32 2147483647, %v2553_v63  ;;  %vm810_vm2 = vweird.f32 %v2553_v63  ;;  %971 = vmatpush.msrb.mxu2 %v936_v56  ;;  %996 = vmatpush.msrb.mxu3 %v933_v9  ;;  %v1109_v56 = vld [vmem:[#allocation11 + $0x98] sm:$0xff]  ;;  %v1227_v9 = vld [vmem:[#allocation10 + $0x2e8] sm:$0xff] }
 0x1a1   : > { %v793_v52 = vadd.f32 %v787_v10, %v760_v37  ;;  %v909_v10 = vld [vmem:[#allocation8 + $0x170] sm:$0xff] }
 0x1a2   : > { %v817_v53 = vor.u32 1.1754944e-38, %v816_v38  ;;  %vm815_vm4 = vcmp.eq.f32.partialorder %v814_v43, 8.507059e+37  ;;  %972 = vmatpush.msrb.mxu2 %v934_v61  ;;  %1014 = vmatpush.msra.mxu0 %v909_v10  ;;  %v1106_v61 = vld [vmem:[#allocation11 + $0x80] sm:$0xff] }
 0x1a3   : > { %997 = vmatpush.msrb.mxu3 %v931_v13  ;;  %v1224_v13 = vld [vmem:[#allocation10 + $0x2d0] sm:$0xff] }
 0x1a4   : > { %973 = vmatpush.msrb.mxu2 %v932_v8  ;;  %1015 = vmatpush.msra.mxu0 %v907_v14  ;;  %v1226_v8 = vld [vmem:[#allocation10 + $0x2e0] sm:$0xff]  ;;  %v1225_v14 = vld [vmem:[#allocation10 + $0x2d8] sm:$0xff] }
 0x1a5   : > { %v1890_v17 = vpop.eup %1889 }
 0x1a6   : > { %v2557_v21 = vpop.eup %1891  ;;  %v2561_v24 = vadd.f32 1.0, %v1890_v17  ;;  %974 = vmatpush.msrb.mxu2 %v930_v12  ;;  %v929_v17 = vld [vmem:[#allocation10 + $0x108] sm:$0xff]  ;;  %1016 = vmatpush.msra.mxu0 %v905_v18 }
 0x1a7   : > { %v806_v28 = vmul.f32 %v2557_v21, %v2553_v63  ;;  %vm811_vm1 = vweird.f32 %v2557_v21  ;;  %998 = vmatpush.msrb.mxu3 %v929_v17  ;;  %v1223_v18 = vld [vmem:[#allocation10 + $0x2c8] sm:$0xff] }
 0x1a8   : > { %1893 = vrcp.f32 %v2561_v24  ;;  %vm812_vm3 = vmor %vm810_vm2, %vm811_vm1  ;;  %v831_v63 = vand.u32 2147483648, %v2561_v24  ;;  %v829_v1 = vand.u32 2147483647, %v2561_v24  ;;  %vm825_vm6 = vweird.f32 %v2561_v24  ;;  %975 = vmatpush.msrb.mxu2 %v928_v16  ;;  %v1222_v16 = vld [vmem:[#allocation10 + $0x2c0] sm:$0xff] }
 0x1a9   : > { %v807_v34 = vsub.f32 1.0, %v806_v28  ;;  %1895 = vtanh.f32 %v791_v23  ;;  %v904_v23 = vld [vmem:[#allocation8 + $0x148] sm:$0xff]  ;;  %v897_v28 = vld [vmem:[#allocation8 + $0x110] sm:$0xff]  ;;  %vm1158_vm2 = vcmask 1043456  }
 0x1aa   : > { %1897 = vtanh.f32 %v793_v52  ;;  %v832_v3 = vor.u32 1.1754944e-38, %v831_v63  ;;  %vm830_vm8 = vcmp.eq.f32.partialorder %v829_v1, 8.507059e+37  ;;  %1040 = vmatpush.msra.mxu1 %v904_v23  ;;  %1122 = vmatpush.msra.mxu2 %v1121_v44  ;;  %v1113_v52 = vld [vmem:[#allocation11 + $0xb8] sm:$0xff]  ;;  %v1193_v23 = vld [vmem:[#allocation8 + $0x2e0] sm:$0xff]  ;;  %v1187_v44 = vld [vmem:[#allocation8 + $0x2b0] sm:$0xff] }
 0x1ab   : > { %v808_v42 = vmul.f32 %v2557_v21, %v807_v34 }
 0x1ac   : > { %1041 = vmatpush.msra.mxu1 %v902_v25  ;;  %1123 = vmatpush.msra.mxu2 %v1120_v45  ;;  %v1220_v25 = vld [vmem:[#allocation10 + $0x2b0] sm:$0xff]  ;;  %v1188_v45 = vld [vmem:[#allocation8 + $0x2b8] sm:$0xff] }
 0x1ad   : > { %v809_v48 = vadd.f32 %v2557_v21, %v808_v42 }
 0x1ae   : > { %v1894_v51 = vpop.eup %1893  ;;  %1042 = vmatpush.msra.mxu1 %v900_v27  ;;  %1124 = vmatpush.msra.mxu2 %v1119_v46 }
 0x1af   : > { %v813_v54 = vsel %vm812_vm3, %v2557_v21, %v809_v48  ;;  %v821_v55 = vmul.f32 %v1894_v51, %v2561_v24  ;;  %v1896_v58 = vpop.eup %1895  ;;  %vm826_vm5 = vweird.f32 %v1894_v51  ;;  %v903_v21 = vld [vmem:[#allocation8 + $0x140] sm:$0xff]  ;;  %v901_v24 = vld [vmem:[#allocation8 + $0x130] sm:$0xff]  ;;  %v1117_v48 = vld [vmem:[#allocation11 + $0xd8] sm:$0xff] }
 0x1b0   : > { %v818_v59 = vsel %vm815_vm4, %v817_v53, %v813_v54  ;;  %vm827_vm7 = vmor %vm825_vm6, %vm826_vm5  ;;  %v1898_v5 = vpop.eup %1897  ;;  %1017 = vmatpush.msra.mxu0 %v903_v21  ;;  %1043 = vmatpush.msra.mxu1 %v898_v29  ;;  %v1112_v53 = vld [vmem:[#allocation11 + $0xb0] sm:$0xff]  ;;  %v1111_v54 = vld [vmem:[#allocation11 + $0xa8] sm:$0xff] }
 0x1b1   : > { %v835_v41 = vmul.f32 %v1896_v58, %v818_v59  ;;  %v822_v60 = vsub.f32 1.0, %v821_v55  ;;  %1125 = vmatpush.msra.mxu2 %v1118_v47  ;;  %v1110_v55 = vld [vmem:[#allocation11 + $0xa0] sm:$0xff]  ;;  %v2597_v58 = vld [vmem:[%s2512_s8 + $0x2] sm:$0x3]  ;;  %v1107_v59 = vld [vmem:[#allocation11 + $0x88] sm:$0xff] }
 0x1b2   : > { %1018 = vmatpush.msra.mxu0 %v901_v24  ;;  %1044 = vmatpush.msra.mxu1 %v896_v31  ;;  %v1196_v21 = vld [vmem:[#allocation8 + $0x2f8] sm:$0xff]  ;;  %v1194_v24 = vld [vmem:[#allocation8 + $0x2e8] sm:$0xff]  ;;  %v1191_v29 = vld [vmem:[#allocation8 + $0x2d0] sm:$0xff] }
 0x1b3   : > { %869 = vmatmul.f32.vlgmr.msrb.gmra.mxu1 %v835_v41  ;;  %v823_v0 = vmul.f32 %v1894_v51, %v822_v60  ;;  %1126 = vmatpush.msra.mxu2 %v1117_v48  ;;  %v1056_v60 = vperm.slane %v2597_v58, 1  ;;  %v1218_v31 = vld [vmem:[#allocation10 + $0x2a0] sm:$0xff] }
 0x1b4   : > { %1019 = vmatpush.msra.mxu0 %v899_v26  ;;  %v1221_v26 = vld [vmem:[#allocation10 + $0x2b8] sm:$0xff]  ;;  %1276 = vmatpush.msrb.mxu1 %v1195_v19  ;;  %v1214_v48 = vld [vmem:[#allocation10 + $0x280] sm:$0xff] }
 0x1b5   : > { %v824_v2 = vadd.f32 %v1894_v51, %v823_v0  ;;  %1127 = vmatpush.msra.mxu2 %v1116_v49  ;;  %v1215_v49 = vld [vmem:[#allocation10 + $0x288] sm:$0xff] }
 0x1b6   : > { %1020 = vmatpush.msra.mxu0 %v897_v28  ;;  %v1055_v28 = vperm.slane %v2597_v58, 0  ;;  %1277 = vmatpush.msrb.mxu1 %v1193_v23 }
 0x1b7   : > { %v828_v4 = vsel %vm827_vm7, %v1894_v51, %v824_v2  ;;  %1128 = vmatpush.msra.mxu2 %v1115_v50  ;;  %v1114_v51 = vld [vmem:[#allocation11 + $0xc0] sm:$0xff] }
 0x1b8   : > { %v833_v6 = vsel %vm830_vm8, %v832_v3, %v828_v4  ;;  %1021 = vmatpush.msra.mxu0 %v895_v30  ;;  %v1192_v30 = vld [vmem:[#allocation8 + $0x2d8] sm:$0xff]  ;;  %1278 = vmatpush.msrb.mxu1 %v1191_v29  ;;  %v1185_v50 = vld [vmem:[#allocation8 + $0x2a0] sm:$0xff]  ;;  %v1203_v29 = vld [vmem:[#allocation10 + $0x228] sm:$0xff] }
 0x1b9   : > { %v836_v7 = vmul.f32 %v1898_v5, %v833_v6  ;;  %1129 = vmatpush.msra.mxu2 %v1114_v51  ;;  %v1228_v6 = vld [vmem:[#allocation10 + $0x2f0] sm:$0xff]  ;;  %v1186_v51 = vld [vmem:[#allocation8 + $0x2a8] sm:$0xff] }
 0x1ba   : > { %1230 = vmatpush.msra.mxu3 %v1228_v6 }
 0x1bb   : > { %872 = vmatmul.f32.gmra.mxu1 %v836_v7  ;;  %1130 = vmatpush.msra.mxu2 %v1113_v52  ;;  %v1229_v7 = vld [vmem:[#allocation10 + $0x2f8] sm:$0xff] }
 0x1bc   : > { %1253 = vmatpush.msrb.mxu0 %v1229_v7  ;;  %1231 = vmatpush.msra.mxu3 %v1226_v8 }
 0x1bd   : > { %1131 = vmatpush.msra.mxu2 %v1112_v53 }
 0x1be   : > { %1254 = vmatpush.msrb.mxu0 %v1227_v9  ;;  %1232 = vmatpush.msra.mxu3 %v1224_v13 }
 0x1bf   : > { %1132 = vmatpush.msra.mxu2 %v1111_v54  ;;  %v1212_v54 = vld [vmem:[#allocation10 + $0x270] sm:$0xff] }
 0x1c0   : > { %1255 = vmatpush.msrb.mxu0 %v1225_v14  ;;  %1233 = vmatpush.msra.mxu3 %v1222_v16  ;;  %v1205_v16 = vld [vmem:[#allocation10 + $0x238] sm:$0xff] }
 0x1c1   : > { %1133 = vmatpush.msra.mxu2 %v1110_v55  ;;  %v1213_v55 = vld [vmem:[#allocation10 + $0x278] sm:$0xff] }
 0x1c2   : > { %1256 = vmatpush.msrb.mxu0 %v1223_v18  ;;  %1234 = vmatpush.msra.mxu3 %v1220_v25 }
 0x1c3   : > { %1134 = vmatpush.msra.mxu2 %v1109_v56 }
 0x1c4   : > { %1257 = vmatpush.msrb.mxu0 %v1221_v26  ;;  %1235 = vmatpush.msra.mxu3 %v1218_v31  ;;  %v1180_v31 = vld [vmem:[#allocation8 + $0x278] sm:$0xff] }
 0x1c5   : > { %1135 = vmatpush.msra.mxu2 %v1108_v57 }
 0x1c7   : > { %1136 = vmatpush.msra.mxu2 %v1107_v59  ;;  %v1183_v59 = vld [vmem:[#allocation8 + $0x290] sm:$0xff] }
 0x1c9   : > { %1137 = vmatpush.msra.mxu2 %v1106_v61 }
 0x230   : > { %v870_v33 = vpop.f32.mrf.mxu1 }
 0x231   : > { %v876_v34 = vadd.f32 %v870_v33, %v2539_v20  ;;  %v1189_v33 = vld [vmem:[#allocation8 + $0x2c0] sm:$0xff] }
 0x232   : > { %1279 = vmatpush.msrb.mxu1 %v1189_v33  ;;  %v1201_v33 = vld [vmem:[#allocation10 + $0x218] sm:$0xff] }
 0x233   : > { %v2585_v35 = vadd.f32 %v1882_v32, %v876_v34  ;;  %v1190_v34 = vld [vmem:[#allocation8 + $0x2c8] sm:$0xff] }
 0x234   : > { %1280 = vmatpush.msrb.mxu1 %v1187_v44  ;;  %v1174_v44 = vld [vmem:[#allocation8 + $0x248] sm:$0xff] }
 0x235   : > { %976 = vmatmul.f32.vlgmr.msrb.gmra.mxu2 %v2585_v35  ;;  %999 = vmatmul.f32.vlgmr.msrb.gmra.mxu3 %v2585_v35  ;;  %v889_v40 = vrot.slane %v2585_v35, 6 }
 0x236   : > { %1299 = vmatpush.msrb.mxu2 %v1196_v21  ;;  %1281 = vmatpush.msrb.mxu1 %v1185_v50  ;;  %v1168_v50 = vld [vmem:[#allocation8 + $0x218] sm:$0xff] }
 0x238   : > { %v873_v36 = vpop.f32.mrf.mxu1  ;;  %1300 = vmatpush.msrb.mxu2 %v1194_v24  ;;  %1282 = vmatpush.msrb.mxu1 %v1183_v59 }
 0x239   : > { %v877_v37 = vadd.f32 %v873_v36, %v2543_v22 }
 0x23a   : > { %1301 = vmatpush.msrb.mxu2 %v1192_v30  ;;  %v1179_v30 = vld [vmem:[#allocation8 + $0x270] sm:$0xff] }
 0x23b   : > { %v2590_v38 = vadd.f32 %v1882_v32, %v877_v37  ;;  %v1219_v32 = vld [vmem:[#allocation10 + $0x2a8] sm:$0xff]  ;;  %v1216_v37 = vld [vmem:[#allocation10 + $0x290] sm:$0xff] }
 0x23c   : > { %1258 = vmatpush.msrb.mxu0 %v1219_v32  ;;  %1302 = vmatpush.msrb.mxu2 %v1190_v34  ;;  %v1200_v32 = vld [vmem:[#allocation10 + $0x210] sm:$0xff]  ;;  %v1177_v34 = vld [vmem:[#allocation8 + $0x260] sm:$0xff] }
 0x23d   : > { %979 = vmatmul.f32.gmra.mxu2 %v2590_v38  ;;  %1002 = vmatmul.f32.gmra.mxu3 %v2590_v38  ;;  %v885_v39 = vrot.slane %v2590_v38, 6 }
 0x23e   : > { %1236 = vmatpush.msra.mxu3 %v1216_v37  ;;  %1303 = vmatpush.msrb.mxu2 %v1188_v45  ;;  %v1198_v37 = vld [vmem:[#allocation10 + $0x200] sm:$0xff]  ;;  %v1171_v45 = vld [vmem:[#allocation8 + $0x230] sm:$0xff] }
 0x23f   : > { %v893_v42 = vsel %vm888_vm9, %v885_v39, %v889_v40  ;;  %v890_v43 = vsel %vm888_vm9, %v889_v40, %v885_v39  ;;  %v1217_v39 = vld [vmem:[#allocation10 + $0x298] sm:$0xff] }
 0x240   : > { %1022 = vmatmul.f32.vlgmr.msra.gmra.mxu0 %v893_v42  ;;  %1045 = vmatmul.f32.vlgmr.msra.gmra.mxu1 %v893_v42 }
 0x241   : > { %1259 = vmatpush.msrb.mxu0 %v1217_v39  ;;  %1237 = vmatpush.msra.mxu3 %v1214_v48  ;;  %v1199_v39 = vld [vmem:[#allocation10 + $0x208] sm:$0xff] }
 0x242   : > { %1304 = vmatpush.msrb.mxu2 %v1186_v51  ;;  %v1170_v48 = vld [vmem:[#allocation8 + $0x228] sm:$0xff]  ;;  %v1165_v51 = vld [vmem:[#allocation8 + $0x200] sm:$0xff] }
 0x243   : > { %1260 = vmatpush.msrb.mxu0 %v1215_v49  ;;  %1238 = vmatpush.msra.mxu3 %v1212_v54  ;;  %v1167_v49 = vld [vmem:[#allocation8 + $0x210] sm:$0xff] }
 0x245   : > { %1261 = vmatpush.msrb.mxu0 %v1213_v55 }
 0x248   : > { %1025 = vmatmul.f32.gmra.mxu0 %v890_v43  ;;  %1048 = vmatmul.f32.gmra.mxu1 %v890_v43 }
 0x2b8   : > { %v1000_v41 = vpop.f32.mrf.mxu3  ;;  %v977_v17 = vpop.f32.mrf.mxu2 }
 0x2bd   : > { %v1046_v62 = vpop.f32.mrf.mxu1  ;;  %v1023_v11 = vpop.f32.mrf.mxu0 }
 0x2be   : > { %v1047_v63 = vadd.f32 %v1046_v62, %v1000_v41  ;;  %v1024_v27 = vadd.f32 %v1023_v11, %v977_v17  ;;  %v1184_v41 = vld [vmem:[#allocation8 + $0x298] sm:$0xff]  ;;  %v1210_v62 = vld [vmem:[#allocation10 + $0x260] sm:$0xff]  ;;  %v1207_v11 = vld [vmem:[#allocation10 + $0x248] sm:$0xff] }
 0x2bf   : > { %1305 = vmatpush.msrb.mxu2 %v1184_v41  ;;  %1239 = vmatpush.msra.mxu3 %v1210_v62 }
 0x2c0   : > { %v1060_v0 = vadd.f32 %v1056_v60, %v1047_v63  ;;  %v1003_v2 = vpop.f32.mrf.mxu3  ;;  %v1059_v42 = vadd.f32 %v1055_v28, %v1024_v27  ;;  %v980_v53 = vpop.f32.mrf.mxu2  ;;  %v1211_v63 = vld [vmem:[#allocation10 + $0x268] sm:$0xff] }
 0x2c1   : > { %1262 = vmatpush.msrb.mxu0 %v1211_v63  ;;  %v1391_v63 = vld [vmem:[#allocation11 + $0x178] sm:$0xff] }
 0x2c2   : > { %v1712_v1 = vmul.f32 -1.442695, %v1060_v0  ;;  %v1181_v0 = vld [vmem:[#allocation8 + $0x280] sm:$0xff] }
 0x2c3   : > { %1283 = vmatpush.msrb.mxu1 %v1181_v0  ;;  %v1389_v0 = vld [vmem:[#allocation11 + $0x168] sm:$0xff] }
 0x2c4   : > { %1899 = vpow2.f32 %v1712_v1  ;;  %v1182_v1 = vld [vmem:[#allocation8 + $0x288] sm:$0xff] }
 0x2c5   : > { %v1049_v3 = vpop.f32.mrf.mxu1  ;;  %v1026_v47 = vpop.f32.mrf.mxu0  ;;  %1306 = vmatpush.msrb.mxu2 %v1182_v1  ;;  %1284 = vmatpush.msrb.mxu1 %v1179_v30  ;;  %v1388_v1 = vld [vmem:[#allocation11 + $0x160] sm:$0xff] }
 0x2c6   : > { %v1050_v4 = vadd.f32 %v1049_v3, %v1003_v2  ;;  %v1027_v56 = vadd.f32 %v1026_v47, %v980_v53  ;;  %v1208_v3 = vld [vmem:[#allocation10 + $0x250] sm:$0xff]  ;;  %v1169_v47 = vld [vmem:[#allocation8 + $0x220] sm:$0xff] }
 0x2c7   : > { %1240 = vmatpush.msra.mxu3 %v1208_v3  ;;  %1307 = vmatpush.msrb.mxu2 %v1180_v31  ;;  %v1883_v53 = vld [vmem:[%s2703_s7 + $0x1] ss:$0 sm:$0xff]  ;;  %v1441_v31 = vld [vmem:[#allocation13 + $0x68] sm:$0xff] }
 0x2c8   : > { %v1062_v5 = vadd.f32 %v1056_v60, %v1050_v4  ;;  %v1209_v4 = vld [vmem:[#allocation10 + $0x258] sm:$0xff]  ;;  %v1061_v6 = vadd.f32 %v1055_v28, %v1027_v56  ;;  %v1202_v28 = vld [vmem:[#allocation10 + $0x220] sm:$0xff]  ;;  %1285 = vmatpush.msrb.mxu1 %v1177_v34  ;;  %v1386_v3 = vld [vmem:[#allocation11 + $0x150] sm:$0xff] }
 0x2c9   : > { %1263 = vmatpush.msrb.mxu0 %v1209_v4  ;;  %v1385_v4 = vld [vmem:[#allocation11 + $0x148] sm:$0xff]  ;;  %v1440_v34 = vld [vmem:[#allocation13 + $0x60] sm:$0xff] }
 0x2ca   : > { %v1900_v10 = vpop.eup %1899  ;;  %v1713_v12 = vmul.f32 -1.442695, %v1062_v5 }
 0x2cb   : > { %v2600_v15 = vadd.f32 1.0, %v1900_v10  ;;  %v1206_v10 = vld [vmem:[#allocation10 + $0x240] sm:$0xff]  ;;  %1264 = vmatpush.msrb.mxu0 %v1207_v11  ;;  %v1378_v11 = vld [vmem:[#allocation11 + $0x110] sm:$0xff] }
 0x2cc   : > { %1901 = vpow2.f32 %v1713_v12  ;;  %1241 = vmatpush.msra.mxu3 %v1206_v10  ;;  %v1379_v10 = vld [vmem:[#allocation11 + $0x118] sm:$0xff] }
 0x2cd   : > { %1903 = vrcp.f32 %v2600_v15  ;;  %v1084_v57 = vand.u32 2147483648, %v2600_v15  ;;  %v1082_v61 = vand.u32 2147483647, %v2600_v15  ;;  %vm1078_vm11 = vweird.f32 %v2600_v15  ;;  %1265 = vmatpush.msrb.mxu0 %v1205_v16  ;;  %v1376_v16 = vld [vmem:[#allocation11 + $0x100] sm:$0xff] }
 0x2cf   : > { %v1085_v7 = vor.u32 1.1754944e-38, %v1084_v57  ;;  %vm1083_vm13 = vcmp.eq.f32.partialorder %v1082_v61, 8.507059e+37  ;;  %1266 = vmatpush.msrb.mxu0 %v1203_v29 }
 0x2d1   : > { %1267 = vmatpush.msrb.mxu0 %v1201_v33 }
 0x2d2   : > { %v1902_v36 = vpop.eup %1901 }
 0x2d3   : > { %v2604_v40 = vpop.eup %1903  ;;  %v2608_v43 = vadd.f32 1.0, %v1902_v36  ;;  %v1178_v36 = vld [vmem:[#allocation8 + $0x268] sm:$0xff]  ;;  %1268 = vmatpush.msrb.mxu0 %v1199_v39 }
 0x2d4   : > { %v1074_v46 = vmul.f32 %v2604_v40, %v2600_v15  ;;  %vm1079_vm10 = vweird.f32 %v2604_v40  ;;  %v1204_v15 = vld [vmem:[#allocation10 + $0x230] sm:$0xff]  ;;  %1308 = vmatpush.msrb.mxu2 %v1178_v36  ;;  %v1439_v36 = vld [vmem:[#allocation13 + $0x58] sm:$0xff] }
 0x2d5   : > { %1905 = vrcp.f32 %v2608_v43  ;;  %vm1080_vm12 = vmor %vm1078_vm11, %vm1079_vm10  ;;  %v1099_v17 = vand.u32 2147483648, %v2608_v43  ;;  %v1097_v19 = vand.u32 2147483647, %v2608_v43  ;;  %1242 = vmatpush.msra.mxu3 %v1204_v15  ;;  %vm1093_vm15 = vweird.f32 %v2608_v43 }
 0x2d6   : > { %v1075_v52 = vsub.f32 1.0, %v1074_v46  ;;  %1907 = vtanh.f32 %v1059_v42  ;;  %v1176_v42 = vld [vmem:[#allocation8 + $0x258] sm:$0xff] }
 0x2d7   : > { %1909 = vtanh.f32 %v1061_v6  ;;  %v1100_v23 = vor.u32 1.1754944e-38, %v1099_v17  ;;  %vm1098_vm1 = vcmp.eq.f32.partialorder %v1097_v19, 8.507059e+37  ;;  %1243 = vmatpush.msra.mxu3 %v1202_v28  ;;  %1309 = vmatpush.msrb.mxu2 %v1176_v42  ;;  %v1172_v46 = vld [vmem:[#allocation8 + $0x238] sm:$0xff] }
 0x2d8   : > { %v1076_v60 = vmul.f32 %v2604_v40, %v1075_v52  ;;  %v1166_v52 = vld [vmem:[#allocation8 + $0x208] sm:$0xff]  ;;  %v1383_v6 = vld [vmem:[#allocation11 + $0x138] sm:$0xff] }
 0x2d9   : > { %1244 = vmatpush.msra.mxu3 %v1200_v32  ;;  %1310 = vmatpush.msrb.mxu2 %v1174_v44 }
 0x2da   : > { %v1077_v2 = vadd.f32 %v2604_v40, %v1076_v60 }
 0x2db   : > { %v1906_v5 = vpop.eup %1905  ;;  %1245 = vmatpush.msra.mxu3 %v1198_v37  ;;  %1311 = vmatpush.msrb.mxu2 %v1172_v46 }
 0x2dc   : > { %v1081_v8 = vsel %vm1080_vm12, %v2604_v40, %v1077_v2  ;;  %v1089_v9 = vmul.f32 %v1906_v5, %v2608_v43  ;;  %v1908_v12 = vpop.eup %1907  ;;  %vm1094_vm14 = vweird.f32 %v1906_v5  ;;  %v1175_v40 = vld [vmem:[#allocation8 + $0x250] sm:$0xff]  ;;  %v1173_v43 = vld [vmem:[#allocation8 + $0x240] sm:$0xff]  ;;  %v1387_v2 = vld [vmem:[#allocation11 + $0x158] sm:$0xff] }
 0x2dd   : > { %v1086_v13 = vsel %vm1083_vm13, %v1085_v7, %v1081_v8  ;;  %vm1095_vm0 = vmor %vm1093_vm15, %vm1094_vm14  ;;  %v1910_v25 = vpop.eup %1909  ;;  %1286 = vmatpush.msrb.mxu1 %v1175_v40  ;;  %1312 = vmatpush.msrb.mxu2 %v1170_v48  ;;  %v1382_v7 = vld [vmem:[#allocation11 + $0x130] sm:$0xff]  ;;  %v1381_v8 = vld [vmem:[#allocation11 + $0x128] sm:$0xff] }
 0x2de   : > { %v1103_v58 = vmul.f32 %v1908_v12, %v1086_v13  ;;  %v1090_v14 = vsub.f32 1.0, %v1089_v9  ;;  %1392 = vmatpush.msrb.mxu3 %v1391_v63  ;;  %v1380_v9 = vld [vmem:[#allocation11 + $0x120] sm:$0xff]  ;;  %v2644_v13 = vld [vmem:[%s2512_s8 + $0x4] sm:$0x3]  ;;  %v1438_v40 = vld [vmem:[#allocation13 + $0x50] sm:$0xff] }
 0x2df   : > { %1287 = vmatpush.msrb.mxu1 %v1173_v43  ;;  %1313 = vmatpush.msrb.mxu2 %v1168_v50  ;;  %v1325_v39 = vperm.slane %v2644_v13, 0  ;;  %v1437_v43 = vld [vmem:[#allocation13 + $0x48] sm:$0xff] }
 0x2e0   : > { %1138 = vmatmul.f32.vlgmr.msra.gmra.mxu2 %v1103_v58  ;;  %v1091_v18 = vmul.f32 %v1906_v5, %v1090_v14  ;;  %v1377_v58 = vld [vmem:[#allocation11 + $0x108] sm:$0xff]  ;;  %v1326_v14 = vperm.slane %v2644_v13, 1 }
 0x2e1   : > { %1288 = vmatpush.msrb.mxu1 %v1171_v45  ;;  %1314 = vmatpush.msrb.mxu2 %v1166_v52  ;;  %v1435_v52 = vld [vmem:[#allocation13 + $0x38] sm:$0xff] }
 0x2e2   : > { %v1092_v21 = vadd.f32 %v1906_v5, %v1091_v18 }
 0x2e3   : > { %1289 = vmatpush.msrb.mxu1 %v1169_v47 }
 0x2e4   : > { %v1096_v24 = vsel %vm1095_vm0, %v1906_v5, %v1092_v21  ;;  %v1384_v5 = vld [vmem:[#allocation11 + $0x140] sm:$0xff] }
 0x2e5   : > { %v1101_v26 = vsel %vm1098_vm1, %v1100_v23, %v1096_v24  ;;  %1290 = vmatpush.msrb.mxu1 %v1167_v49  ;;  %v1436_v49 = vld [vmem:[#allocation13 + $0x40] sm:$0xff] }
 0x2e6   : > { %v1104_v27 = vmul.f32 %v1910_v25, %v1101_v26  ;;  %v1443_v26 = vld [vmem:[#allocation13 + $0x78] sm:$0xff] }
 0x2e7   : > { %1291 = vmatpush.msrb.mxu1 %v1165_v51  ;;  %1448 = vmatpush.msra.mxu0 %v1443_v26 }
 0x2e8   : > { %1141 = vmatmul.f32.gmra.mxu2 %v1104_v27  ;;  %v1442_v27 = vld [vmem:[#allocation13 + $0x70] sm:$0xff] }
 0x2e9   : > { %1726 = vmatpush.msra.mxu2 %v1443_v26  ;;  %1449 = vmatpush.msra.mxu0 %v1442_v27  ;;  %v1482_v26 = vld [vmem:[#allocation14 + $0x48] sm:$0xff] }
 0x2eb   : > { %1727 = vmatpush.msra.mxu2 %v1442_v27  ;;  %1450 = vmatpush.msra.mxu0 %v1441_v31  ;;  %v1481_v27 = vld [vmem:[#allocation14 + $0x40] sm:$0xff] }
 0x2ed   : > { %1728 = vmatpush.msra.mxu2 %v1441_v31  ;;  %1451 = vmatpush.msra.mxu0 %v1440_v34 }
 0x2ef   : > { %1729 = vmatpush.msra.mxu2 %v1440_v34  ;;  %1452 = vmatpush.msra.mxu0 %v1439_v36  ;;  %v1478_v34 = vld [vmem:[#allocation14 + $0x28] sm:$0xff] }
 0x2f1   : > { %1730 = vmatpush.msra.mxu2 %v1439_v36  ;;  %1453 = vmatpush.msra.mxu0 %v1438_v40 }
 0x2f3   : > { %1731 = vmatpush.msra.mxu2 %v1438_v40  ;;  %1454 = vmatpush.msra.mxu0 %v1437_v43  ;;  %v1476_v40 = vld [vmem:[#allocation14 + $0x18] sm:$0xff] }
 0x2f5   : > { %1732 = vmatpush.msra.mxu2 %v1437_v43  ;;  %1455 = vmatpush.msra.mxu0 %v1436_v49 }
 0x2f7   : > { %1733 = vmatpush.msra.mxu2 %v1436_v49  ;;  %1456 = vmatpush.msra.mxu0 %v1435_v52 }
 0x2f9   : > { %1734 = vmatpush.msra.mxu2 %v1435_v52 }
 0x363   : > { %v1139_v54 = vpop.f32.mrf.mxu2 }
 0x364   : > { %v1145_v55 = vadd.f32 %v1139_v54, %v2585_v35 }
 0x366   : > { %v2632_v56 = vadd.f32 %v1883_v53, %v1145_v55 }
 0x368   : > { %1246 = vmatmul.f32.vlgmr.msra.gmra.mxu3 %v2632_v56  ;;  %1269 = vmatmul.f32.vlgmr.msrb.gmra.mxu0 %v2632_v56  ;;  %v1159_v35 = vrot.slane %v2632_v56, 4 }
 0x36b   : > { %v1142_v57 = vpop.f32.mrf.mxu2 }
 0x36c   : > { %v1146_v59 = vadd.f32 %v1142_v57, %v2590_v38  ;;  %v1390_v38 = vld [vmem:[#allocation11 + $0x170] sm:$0xff] }
 0x36d   : > { %1393 = vmatpush.msrb.mxu3 %v1390_v38 }
 0x36e   : > { %v2637_v41 = vadd.f32 %v1883_v53, %v1146_v59  ;;  %v1434_v59 = vld [vmem:[#allocation13 + $0x30] sm:$0xff] }
 0x36f   : > { %1394 = vmatpush.msrb.mxu3 %v1389_v0  ;;  %1457 = vmatpush.msra.mxu0 %v1434_v59 }
 0x370   : > { %1249 = vmatmul.f32.gmra.mxu3 %v2637_v41  ;;  %1272 = vmatmul.f32.gmra.mxu0 %v2637_v41  ;;  %v1155_v60 = vrot.slane %v2637_v41, 4 }
 0x371   : > { %1395 = vmatpush.msrb.mxu3 %v1388_v1  ;;  %1735 = vmatpush.msra.mxu2 %v1434_v59 }
 0x372   : > { %v1163_v61 = vsel %vm1158_vm2, %v1155_v60, %v1159_v35  ;;  %v1160_v62 = vsel %vm1158_vm2, %v1159_v35, %v1155_v60  ;;  %v1433_v35 = vld [vmem:[#allocation13 + $0x28] sm:$0xff] }
 0x373   : > { %1292 = vmatmul.f32.vlgmr.msrb.gmra.mxu1 %v1163_v61  ;;  %1315 = vmatmul.f32.vlgmr.msrb.gmra.mxu2 %v1163_v61 }
 0x374   : > { %1396 = vmatpush.msrb.mxu3 %v1387_v2  ;;  %1458 = vmatpush.msra.mxu0 %v1433_v35 }
 0x375   : > { %1736 = vmatpush.msra.mxu2 %v1433_v35 }
 0x376   : > { %1397 = vmatpush.msrb.mxu3 %v1386_v3 }
 0x378   : > { %1398 = vmatpush.msrb.mxu3 %v1385_v4 }
 0x37a   : > { %1399 = vmatpush.msrb.mxu3 %v1384_v5 }
 0x37b   : > { %1295 = vmatmul.f32.gmra.mxu1 %v1160_v62  ;;  %1318 = vmatmul.f32.gmra.mxu2 %v1160_v62 }
 0x37c   : > { %1400 = vmatpush.msrb.mxu3 %v1383_v6 }
 0x37e   : > { %1401 = vmatpush.msrb.mxu3 %v1382_v7 }
 0x380   : > { %1402 = vmatpush.msrb.mxu3 %v1381_v8 }
 0x382   : > { %1403 = vmatpush.msrb.mxu3 %v1380_v9 }
 0x384   : > { %1404 = vmatpush.msrb.mxu3 %v1379_v10 }
 0x386   : > { %1405 = vmatpush.msrb.mxu3 %v1378_v11 }
 0x388   : > { %1406 = vmatpush.msrb.mxu3 %v1377_v58  ;;  %v1432_v58 = vld [vmem:[#allocation13 + $0x20] sm:$0xff] }
 0x389   : > { %1459 = vmatpush.msra.mxu0 %v1432_v58  ;;  %1737 = vmatpush.msra.mxu2 %v1432_v58 }
 0x38a   : > { %1407 = vmatpush.msrb.mxu3 %v1376_v16  ;;  %v1429_v16 = vld [vmem:[#allocation13 + $0x8] sm:$0xff] }
 0x3e5   : > { %v1270_v12 = vpop.f32.mrf.mxu0 }
 0x3eb   : > { %v1247_v33 = vpop.f32.mrf.mxu3 }
 0x3ed   : > { %v1273_v21 = vpop.f32.mrf.mxu0 }
 0x3f0   : > { %v1293_v29 = vpop.f32.mrf.mxu1 }
 0x3f1   : > { %v1294_v37 = vadd.f32 %v1293_v29, %v1247_v33  ;;  %v1480_v29 = vld [vmem:[#allocation14 + $0x38] sm:$0xff] }
 0x3f3   : > { %v1329_v45 = vadd.f32 %v1325_v39, %v1294_v37  ;;  %v1250_v50 = vpop.f32.mrf.mxu3  ;;  %v1477_v37 = vld [vmem:[#allocation14 + $0x20] sm:$0xff] }
 0x3f6   : > { %v1316_v15 = vpop.f32.mrf.mxu2 }
 0x3f7   : > { %v1317_v17 = vadd.f32 %v1316_v15, %v1270_v12  ;;  %v1430_v15 = vld [vmem:[#allocation13 + $0x10] sm:$0xff] }
 0x3f8   : > { %v1296_v48 = vpop.f32.mrf.mxu1 }
 0x3f9   : > { %v1330_v18 = vadd.f32 %v1326_v14, %v1317_v17  ;;  %v1297_v53 = vadd.f32 %v1296_v48, %v1250_v50  ;;  %v1428_v17 = vld [vmem:[#allocation13] sm:$0xff] }
 0x3fb   : > { %v1716_v19 = vmul.f32 -1.442695, %v1330_v18  ;;  %v1331_v62 = vadd.f32 %v1325_v39, %v1297_v53  ;;  %v1488_v18 = vld [vmem:[#allocation14 + $0x78] sm:$0xff]  ;;  %v1886_v53 = vld [vmem:[%s2740_s15] ss:$0 sm:$0xff] }
 0x3fc   : > { %1493 = vmatpush.msra.mxu1 %v1488_v18  ;;  %1742 = vmatpush.msra.mxu3 %v1488_v18 }
 0x3fd   : > { %1911 = vpow2.f32 %v1716_v19  ;;  %v1487_v19 = vld [vmem:[#allocation14 + $0x70] sm:$0xff] }
 0x3fe   : > { %v1319_v23 = vpop.f32.mrf.mxu2  ;;  %1494 = vmatpush.msra.mxu1 %v1487_v19  ;;  %1743 = vmatpush.msra.mxu3 %v1487_v19 }
 0x3ff   : > { %v1320_v24 = vadd.f32 %v1319_v23, %v1273_v21  ;;  %v1486_v21 = vld [vmem:[#allocation14 + $0x68] sm:$0xff]  ;;  %v1485_v23 = vld [vmem:[#allocation14 + $0x60] sm:$0xff] }
 0x400   : > { %1495 = vmatpush.msra.mxu1 %v1486_v21  ;;  %1744 = vmatpush.msra.mxu3 %v1486_v21 }
 0x401   : > { %v1332_v25 = vadd.f32 %v1326_v14, %v1320_v24  ;;  %v1431_v14 = vld [vmem:[#allocation13 + $0x18] sm:$0xff] }
 0x402   : > { %1460 = vmatpush.msra.mxu0 %v1431_v14  ;;  %1738 = vmatpush.msra.mxu2 %v1431_v14  ;;  %v1484_v24 = vld [vmem:[#allocation14 + $0x58] sm:$0xff] }
 0x403   : > { %v1912_v28 = vpop.eup %1911  ;;  %v1717_v30 = vmul.f32 -1.442695, %v1332_v25  ;;  %1496 = vmatpush.msra.mxu1 %v1485_v23  ;;  %1745 = vmatpush.msra.mxu3 %v1485_v23  ;;  %v1483_v25 = vld [vmem:[#allocation14 + $0x50] sm:$0xff] }
 0x404   : > { %v1341_v32 = vadd.f32 1.0, %v1912_v28  ;;  %1461 = vmatpush.msra.mxu0 %v1430_v15  ;;  %1739 = vmatpush.msra.mxu2 %v1430_v15  ;;  %v1884_v28 = vld [vmem:[%s2703_s7 + $0x2] ss:$0 sm:$0xff] }
 0x405   : > { %1913 = vpow2.f32 %v1717_v30  ;;  %1497 = vmatpush.msra.mxu1 %v1484_v24  ;;  %1746 = vmatpush.msra.mxu3 %v1484_v24 }
 0x406   : > { %1915 = vrcp.f32 %v1341_v32  ;;  %v1354_v54 = vand.u32 2147483648, %v1341_v32  ;;  %v1352_v57 = vand.u32 2147483647, %v1341_v32  ;;  %vm1348_vm4 = vweird.f32 %v1341_v32  ;;  %1462 = vmatpush.msra.mxu0 %v1429_v16  ;;  %1740 = vmatpush.msra.mxu2 %v1429_v16 }
 0x407   : > { %1498 = vmatpush.msra.mxu1 %v1483_v25  ;;  %1747 = vmatpush.msra.mxu3 %v1483_v25 }
 0x408   : > { %v1355_v63 = vor.u32 1.1754944e-38, %v1354_v54  ;;  %vm1353_vm6 = vcmp.eq.f32.partialorder %v1352_v57, 8.507059e+37  ;;  %1463 = vmatpush.msra.mxu0 %v1428_v17  ;;  %1741 = vmatpush.msra.mxu2 %v1428_v17 }
 0x409   : > { %1499 = vmatpush.msra.mxu1 %v1482_v26  ;;  %1748 = vmatpush.msra.mxu3 %v1482_v26 }
 0x40b   : > { %v1914_v42 = vpop.eup %1913  ;;  %1500 = vmatpush.msra.mxu1 %v1481_v27  ;;  %1749 = vmatpush.msra.mxu3 %v1481_v27 }
 0x40c   : > { %v1916_v44 = vpop.eup %1915  ;;  %v1342_v46 = vadd.f32 1.0, %v1914_v42 }
 0x40d   : > { %v1344_v47 = vmul.f32 %v1916_v44, %v1341_v32  ;;  %vm1349_vm3 = vweird.f32 %v1916_v44  ;;  %v1479_v32 = vld [vmem:[#allocation14 + $0x30] sm:$0xff]  ;;  %1501 = vmatpush.msra.mxu1 %v1480_v29  ;;  %1750 = vmatpush.msra.mxu3 %v1480_v29 }
 0x40e   : > { %1917 = vrcp.f32 %v1342_v46  ;;  %vm1350_vm5 = vmor %vm1348_vm4, %vm1349_vm3  ;;  %v1369_v5 = vand.u32 2147483648, %v1342_v46  ;;  %v1367_v7 = vand.u32 2147483647, %v1342_v46  ;;  %vm1363_vm8 = vweird.f32 %v1342_v46 }
 0x40f   : > { %v1345_v51 = vsub.f32 1.0, %v1344_v47  ;;  %1919 = vtanh.f32 %v1329_v45  ;;  %1502 = vmatpush.msra.mxu1 %v1479_v32  ;;  %1751 = vmatpush.msra.mxu3 %v1479_v32  ;;  %v1473_v47 = vld [vmem:[#allocation14] sm:$0xff] }
 0x410   : > { %1921 = vtanh.f32 %v1331_v62  ;;  %v1370_v9 = vor.u32 1.1754944e-38, %v1369_v5  ;;  %vm1368_vm10 = vcmp.eq.f32.partialorder %v1367_v7, 8.507059e+37 }
 0x411   : > { %v1346_v55 = vmul.f32 %v1916_v44, %v1345_v51  ;;  %1503 = vmatpush.msra.mxu1 %v1478_v34  ;;  %1752 = vmatpush.msra.mxu3 %v1478_v34 }
 0x413   : > { %v1347_v60 = vadd.f32 %v1916_v44, %v1346_v55  ;;  %1504 = vmatpush.msra.mxu1 %v1477_v37  ;;  %1753 = vmatpush.msra.mxu3 %v1477_v37 }
 0x414   : > { %v1918_v61 = vpop.eup %1917 }
 0x415   : > { %v1351_v38 = vsel %vm1350_vm5, %v1916_v44, %v1347_v60  ;;  %v1359_v0 = vmul.f32 %v1918_v61, %v1342_v46  ;;  %v1920_v1 = vpop.eup %1919  ;;  %vm1364_vm7 = vweird.f32 %v1918_v61  ;;  %1505 = vmatpush.msra.mxu1 %v1476_v40  ;;  %1754 = vmatpush.msra.mxu3 %v1476_v40  ;;  %v1475_v46 = vld [vmem:[#allocation14 + $0x10] sm:$0xff] }
 0x416   : > { %v1356_v2 = vsel %vm1353_vm6, %v1355_v63, %v1351_v38  ;;  %vm1365_vm9 = vmor %vm1363_vm8, %vm1364_vm7  ;;  %v1922_v11 = vpop.eup %1921 }
 0x417   : > { %v1373_v3 = vmul.f32 %v1920_v1, %v1356_v2  ;;  %v1360_v4 = vsub.f32 1.0, %v1359_v0  ;;  %1506 = vmatpush.msra.mxu1 %v1475_v46  ;;  %1755 = vmatpush.msra.mxu3 %v1475_v46 }
 0x419   : > { %1408 = vmatmul.f32.vlgmr.msrb.gmra.mxu3 %v1373_v3  ;;  %v1361_v6 = vmul.f32 %v1918_v61, %v1360_v4 }
 0x41b   : > { %v1362_v8 = vadd.f32 %v1918_v61, %v1361_v6 }
 0x41d   : > { %v1366_v10 = vsel %vm1365_vm9, %v1918_v61, %v1362_v8 }
 0x41e   : > { %v1371_v12 = vsel %vm1368_vm10, %v1370_v9, %v1366_v10 }
 0x41f   : > { %v1374_v13 = vmul.f32 %v1922_v11, %v1371_v12 }
 0x421   : > { %1411 = vmatmul.f32.gmra.mxu3 %v1374_v13 }
 0x49c   : > { %v1409_v30 = vpop.f32.mrf.mxu3 }
 0x49d   : > { %v1415_v31 = vadd.f32 %v1409_v30, %v2632_v56 }
 0x49f   : > { %v1422_v33 = vadd.f32 %v1884_v28, %v1415_v31 }
 0x4a1   : > { %v1424_v36 = vsub.f32 %v1422_v33, %v2539_v20  ;;  %v1474_v20 = vld [vmem:[#allocation14 + $0x8] sm:$0xff] }
 0x4a2   : > { %1507 = vmatpush.msra.mxu1 %v1474_v20  ;;  %1756 = vmatpush.msra.mxu3 %v1474_v20 }
 0x4a3   : > { %v1426_v39 = vmax.f32 %v1424_v36, 0.0 }
 0x4a4   : > { %v1412_v42 = vpop.f32.mrf.mxu3  ;;  %1508 = vmatpush.msra.mxu1 %v1473_v47  ;;  %1757 = vmatpush.msra.mxu3 %v1473_v47 }
 0x4a5   : > { %v1416_v43 = vadd.f32 %v1412_v42, %v2637_v41  ;;  %1464 = vmatmul.f32.vlgmr.msra.gmra.mxu0 %v1426_v39  ;;  %v1885_v41 = vld [vmem:[%s2739_s23] ss:$0 sm:$0xff] }
 0x4a7   : > { %v1423_v56 = vadd.f32 %v1884_v28, %v1416_v43 }
 0x4a9   : > { %v1425_v44 = vsub.f32 %v1423_v56, %v2543_v22 }
 0x4ab   : > { %v1427_v45 = vmax.f32 %v1425_v44, 0.0 }
 0x4ad   : > { %1467 = vmatmul.f32.vlgmr.msra.gmra.mxu2 %v1427_v45 }
 0x522   : > { %v1465_v48 = vpop.f32.mrf.mxu0 }
 0x523   : > { %v1466_v49 = vadd.f32 %v1885_v41, %v1465_v48 }
 0x525   : > { %v1471_v22 = vmax.f32 %v1466_v49, 0.0 }
 0x527   : > { %1509 = vmatmul.f32.vlgmr.msra.gmra.mxu1 %v1471_v22 }
 0x530   : > { %v1468_v50 = vpop.f32.mrf.mxu2 }
 0x531   : > { %v1469_v51 = vadd.f32 %v1885_v41, %v1468_v50 }
 0x533   : > { %v1472_v52 = vmax.f32 %v1469_v51, 0.0 }
 0x535   : > { %1512 = vmatmul.f32.vlgmr.msra.gmra.mxu3 %v1472_v52 }
 0x5a4   : > { %v1510_v54 = vpop.f32.mrf.mxu1 }
 0x5a5   : > { %v1511_v55 = vadd.f32 %v1886_v53, %v1510_v54 }
 0x5a7   : > { %1516 = vst [vmem:[%s573_s29] sm:$0xff] %v1511_v55 }
 0x5b8   : > { %v1513_v57 = vpop.f32.mrf.mxu3 }
 0x5b9   : > { %v1514_v59 = vadd.f32 %v1886_v53, %v1513_v57 }
 0x5bb   : > { %1517 = vst [vmem:[%s573_s29 + $0x8] sm:$0xff] %v1514_v59 }
 0x5bc   : > { %2190 = shalt.err (!%p2187_p8)
}
 0x5bd   : > { %s2264_s26 = smov 128   ;;  %s2265_s23 = smov 8  }
 0x5be   : > { %1788 = dma.vmem_to_hbm [thread:$0]  (%p2442_p4), %s1532_s14, 256, %s1534_s9, %s1519_s6, %s2264_s26, %s2264_s26, %s2265_s23  }
 0x5bf PF: > { %s1548_s4 = sand.u32 1, %s2237_s21   ;;  %p2742_p10 = scmp.ge.s32.totalorder %s2249_s24, 2 }
 0x5c0   : > { %s1549_s2 = scalar_lea.sflag [#allocation4], %s1548_s4 }
 0x5c1   : > { %p1817_p13 = pnand %p2742_p10, %p2446_p6 }
 0x5c3   : > { %p1818_p11 = pneg %p1817_p13 }
 0x5c5   : > { %2232 = dma.done.wait (%p1818_p11), %s1549_s2, 256  }
 0x5c6   : > { %2234 = vsyncadd (%p1818_p11), %s1549_s2, 4294967040  ;;  %s2743_s15 = sld [smem:[#allocation24_spill]]  ;;  %p31_p0 = scmp.ge.s32.totalorder %s2414_s18, 4  }
 0x5c7   : > { %s2744_s23 = sld [smem:[#allocation25_spill]]  ;;  %s2745_s21 = smov %s2241_s22 }
 0x5c8   : > { %s2747_s24 = smov %s2414_s18  ;;  %33 = sbr.rel (!%p31_p0) target bundleno = 20 (0x14), region = 160 }
 0x5cc   : > { %s2746_s22 = smov %s2743_s15 }
 0x5cd   :  { %1555 = vsyncpa [#allocation3], 1 }
 0x5ce   :  { %1557 = vsyncpa [#allocation3 + $0x1], 1 }
 0x5cf   :  { %1558 = vsyncpa [#allocation6], 1 }
 0x5d0   :  { %1560 = vsyncpa [#allocation6 + $0x1], 1 }
 0x5d1   :  { %1561 = vsyncpa [#allocation9], 1 }
 0x5d2   :  { %1562 = vsyncpa [#allocation12], 1 }
 0x5d3   :  { %1563 = vsyncpa [#allocation15], 1 }
 0x5d4   :  { %1564 = vsyncpa [#allocation4], 1 }
 0x5d5   :  { %1566 = vsyncpa [#allocation4 + $0x1], 1 }

</bundles_post_ra>
